<compile_context>
chip_gen: v6e
topology: v6e:2x2x1
jax: 0.10.0
libtpu: 0.0.40
codegen_flags: <defaults>
</compile_context>

<pallas_src>
import functools

import jax
import jax.numpy as jnp
from jax import lax
from jax.experimental import pallas as pl
from jax.experimental.pallas import tpu as pltpu


def _round_up(x, m):
    return (x + m - 1) // m * m


def _extdssm_kernel(x1t_ref, x2t_ref, x3t_ref, x4t_ref,
                    embT_ref, emb2_ref, b1cat_ref, w1_ref, w2_ref, b2cat_ref,
                    out_ref, bag_ref, acc_ref, *, use_relu):
    """One (batch tile, vocab chunk) grid step; batch lives on the lane axis."""
    act = (lambda v: jnp.maximum(v, 0.0)) if use_relu else jnp.tanh

    c = pl.program_id(1)
    nc = pl.num_programs(1)

    L1 = x1t_ref.shape[0]
    L2 = x2t_ref.shape[0]
    L3 = x3t_ref.shape[0]
    D, VC = embT_ref.shape
    V2p = emb2_ref.shape[1]
    TB = out_ref.shape[1]

    # Chunk-local vocab iota, offset by the chunk base index.
    iota_v = lax.broadcasted_iota(jnp.int32, (VC, 1), 0) + c * VC

    # ---- per-chunk bags, built with fori_loop(unroll=True) --------------------
    # tower 1: weight fused directly into the compare (no int->float cast).
    def bag1_body(l, b):
        hit = iota_v == x1t_ref[l]                      # (VC, TB)
        return b + jnp.where(hit, x4t_ref[l], 0.0)

    # tower 2: plain one-hot accumulation.
    def bag2_body(l, b):
        hit = iota_v == x2t_ref[l]
        return b + jnp.where(hit, 1.0, 0.0)

    zeros_bag = jnp.zeros((VC, TB), jnp.float32)
    # Halves are written in place into one (VC, 2*TB) scratch: no lane concat.
    bag_ref[:, :TB] = lax.fori_loop(0, L1, bag1_body, zeros_bag, unroll=True)
    bag_ref[:, TB:] = lax.fori_loop(0, L2, bag2_body, zeros_bag, unroll=True)

    # ---- one MXU call per chunk for both towers' embedding sums ---------------
    lhs = embT_ref[...]                                 # (D, VC), f32 or bf16
    rhs = bag_ref[...]                                  # (VC, 2*TB) f32
    if lhs.dtype != jnp.float32:
        rhs = rhs.astype(lhs.dtype)                     # bf16 MXU path
    contrib = jnp.dot(lhs, rhs, preferred_element_type=jnp.float32)  # (D, 2*TB)

    @pl.when(c == 0)
    def _init():
        acc_ref[...] = jnp.zeros_like(acc_ref)

    acc_ref[...] += contrib

    # ---- epilogue: FC layers, tower interaction, position bias, sigmoid -------
    @pl.when(c == nc - 1)
    def _finalize():
        b1 = b1cat_ref[...]                             # (D, 2)
        b2 = b2cat_ref[...]                             # (D, 2)
        h1 = act(acc_ref[:, :TB] + b1[:, 0:1])          # (D, TB)
        h2 = act(acc_ref[:, TB:] + b1[:, 1:2])          # (D, TB)

        # Two direct (D, D) matmuls -- no block-diag weight, no sublane concat.
        r1 = act(jnp.dot(w1_ref[...], h1, preferred_element_type=jnp.float32)
                 + b2[:, 0:1])                          # (D, TB)
        r2 = act(jnp.dot(w2_ref[...], h2, preferred_element_type=jnp.float32)
                 + b2[:, 1:2])                          # (D, TB)

        x12 = jnp.sum(r1 * r2, axis=0, keepdims=True)   # (1, TB)

        # Position bias via a small MXU dot (emb2 lane-padded to V2p, rows 1..7
        # of the emb2 block are zero so only result row 0 is meaningful).
        iota_v2 = lax.broadcasted_iota(jnp.int32, (V2p, 1), 0)

        def bag3_body(l, b):
            hit = iota_v2 == x3t_ref[l]
            return b + jnp.where(hit, 1.0, 0.0)

        bag3 = lax.fori_loop(0, L3, bag3_body,
                             jnp.zeros((V2p, TB), jnp.float32), unroll=True)
        s3 = jnp.dot(emb2_ref[...], bag3,
                     preferred_element_type=jnp.float32)[0:1, :]    # (1, TB)

        out_ref[...] = jax.nn.sigmoid(x12 + s3)         # lane-dense store


def extdssm_forward(x1, x2, x3, x4, params, use_relu=False, block_b=None,
                    use_bf16_table=False):
    B, L1 = x1.shape
    L2 = x2.shape[1]
    L3 = x3.shape[1]
    V, D = params["emb"].shape
    V2 = params["emb2"].shape[0]
    V2p = _round_up(V2, 128)

    # ---- generation-aware VMEM ceiling and tile defaults -----------------------
    try:
        info = pltpu.get_tpu_info()
        cap = int(getattr(info, "vmem_capacity_bytes", 64 * 1024 * 1024))
    except Exception:  # pragma: no cover - conservative fallback
        cap = 64 * 1024 * 1024
    ceiling = (cap * 3) // 4          # ~96 MiB of 128 (v5e/v6e), ~48 of 64 (v7x)

    if block_b is None:
        block_b = 256 if cap <= 64 * 1024 * 1024 else 512
    # Defensive: TB is always a multiple of 128 (lane-dense batch tile).
    TB = _round_up(max(1, min(block_b, _round_up(B, 128))), 128)
    # On 64 MiB parts (v7x: 2 TensorCores) prefer >= 2 batch tiles.
    if cap <= 64 * 1024 * 1024 and B > 128:
        TB = min(TB, _round_up((B + 1) // 2, 128))

    chunked = V > 256
    VC = 512 if chunked else V        # vocab chunk width (full vocab if small)
    tab_bytes = 2 if use_bf16_table else 4

    def need(tb, vc):
        f32 = 4
        nbuf = 2                      # default double-buffering
        io_x = nbuf * f32 * tb * (2 * L1 + L2 + L3)
        io_tab = nbuf * tab_bytes * D * vc
        io_small = nbuf * f32 * (8 * V2p + 4 * D + 2 * D * D)
        io_out = nbuf * f32 * tb
        scratch = f32 * 2 * tb * (vc + D)
        temps = f32 * tb * (3 * vc + V2p + 10 * D + 8)
        return io_x + io_tab + io_small + io_out + scratch + temps + (2 << 20)

    # Shrink (VC, then TB) until the analytic VMEM estimate fits the ceiling.
    while need(TB, VC) > ceiling:
        if chunked and VC > 128:
            VC //= 2
        elif TB > 128:
            TB //= 2
        else:
            break

    Bp = _round_up(B, TB)
    Vp = _round_up(V, VC) if chunked else V
    nc = Vp // VC
    vmem_limit = int(min(ceiling, max(16 * 1024 * 1024, need(TB, VC))))

    # ---- host-side input prep ---------------------------------------------------
    # x tensors are carried transposed (batch on lanes) and reshaped to
    # (L, 1, Bp) so the kernel indexes position l on the major axis.
    # Padded batch columns are zero-filled (index 0 / weight 0) -- see contract
    # at top of file.
    def prep(a, dtype):
        at = jnp.transpose(a.astype(dtype))                       # (L, B)
        at = jnp.pad(at, ((0, 0), (0, Bp - B)))
        return at.reshape(at.shape[0], 1, Bp)

    x1t = prep(x1, jnp.int32)
    x2t = prep(x2, jnp.int32)
    x3t = prep(x3, jnp.int32)
    x4t = prep(x4, jnp.float32)

    embT = jnp.transpose(params["emb"]).astype(jnp.float32)       # (D, V)
    if Vp != V:
        embT = jnp.pad(embT, ((0, 0), (0, Vp - V)))               # zero columns
    if use_bf16_table:
        embT = embT.astype(jnp.bfloat16)

    emb2blk = jnp.zeros((8, V2p), jnp.float32).at[0, :V2].set(
        params["emb2"].astype(jnp.float32))                       # (8, V2p)
    b1cat = jnp.stack([params["t1_bias1"], params["t2_bias1"]],
                      axis=1).astype(jnp.float32)                 # (D, 2)
    b2cat = jnp.stack([params["t1_b"], params["t2_b"]],
                      axis=1).astype(jnp.float32)                 # (D, 2)
    w1 = params["t1_w"].astype(jnp.float32)                       # (D, D)
    w2 = params["t2_w"].astype(jnp.float32)                       # (D, D)

    kernel = functools.partial(_extdssm_kernel, use_relu=use_relu)
    out = pl.pallas_call(
        kernel,
        out_shape=jax.ShapeDtypeStruct((1, Bp), jnp.float32),
        grid=(Bp // TB, nc),
        in_specs=[
            pl.BlockSpec((L1, 1, TB), lambda i, c: (0, 0, i)),    # x1^T
            pl.BlockSpec((L2, 1, TB), lambda i, c: (0, 0, i)),    # x2^T
            pl.BlockSpec((L3, 1, TB), lambda i, c: (0, 0, i)),    # x3^T
            pl.BlockSpec((L1, 1, TB), lambda i, c: (0, 0, i)),    # x4^T
            pl.BlockSpec((D, VC), lambda i, c: (0, c)),           # emb^T chunk
            pl.BlockSpec((8, V2p), lambda i, c: (0, 0)),          # emb2 (padded)
            pl.BlockSpec((D, 2), lambda i, c: (0, 0)),            # [t1_bias1|t2_bias1]
            pl.BlockSpec((D, D), lambda i, c: (0, 0)),            # t1_w
            pl.BlockSpec((D, D), lambda i, c: (0, 0)),            # t2_w
            pl.BlockSpec((D, 2), lambda i, c: (0, 0)),            # [t1_b|t2_b]
        ],
        out_specs=pl.BlockSpec((1, TB), lambda i, c: (0, i)),     # lane-dense out
        scratch_shapes=[
            pltpu.VMEM((VC, 2 * TB), jnp.float32),  # both towers' bags, in place
            pltpu.VMEM((D, 2 * TB), jnp.float32),   # embedding-sum accumulator
        ],
        compiler_params=pltpu.CompilerParams(
            dimension_semantics=("parallel", "arbitrary"),
            vmem_limit_bytes=vmem_limit,
        ),
    )(x1t, x2t, x3t, x4t, embT, emb2blk, b1cat, w1, w2, b2cat)
    return out[0, :B]


def extdssm_reference(x1, x2, x3, x4, params, use_relu=False):
    """Pure-JAX replica of the PyTorch forward (correctness check)."""
    act = (lambda v: jnp.maximum(v, 0.0)) if use_relu else jnp.tanh
    s1 = jnp.sum(params["emb"][x1] * x4[:, :, None], axis=1) + params["t1_bias1"]
    h1 = act(s1)
    h1 = act(h1 @ params["t1_w"].T + params["t1_b"])
    s2 = jnp.sum(params["emb"][x2], axis=1) + params["t2_bias1"]
    h2 = act(s2)
    h2 = act(h2 @ params["t2_w"].T + params["t2_b"])
    x12 = jnp.sum(h1 * h2, axis=1)
    s3 = jnp.sum(params["emb2"][x3], axis=1)
    return jax.nn.sigmoid(x12 + s3)


def init_params(key, input_size, embed_dim, pos_size):
    ks = jax.random.split(key, 6)
    emb = 0.1 * jax.random.normal(ks[0], (input_size, embed_dim), jnp.float32)
    emb = emb.at[0].set(0.0)                    # padding_idx=0
    emb2 = 0.1 * jax.random.normal(ks[1], (pos_size + 1,), jnp.float32)
    emb2 = emb2.at[0].set(0.0)                  # padding_idx=0
    bound = 1.0 / jnp.sqrt(embed_dim)
    t1_w = jax.random.uniform(ks[2], (embed_dim, embed_dim), jnp.float32, -bound, bound)
    t1_b = jax.random.uniform(ks[3], (embed_dim,), jnp.float32, -bound, bound)
    t2_w = jax.random.uniform(ks[4], (embed_dim, embed_dim), jnp.float32, -bound, bound)
    t2_b = jax.random.uniform(ks[5], (embed_dim,), jnp.float32, -bound, bound)
    return {
        "emb": emb,
        "emb2": emb2,
        "t1_bias1": jnp.zeros((embed_dim,), jnp.float32),
        "t1_w": t1_w,
        "t1_b": t1_b,
        "t2_bias1": jnp.zeros((embed_dim,), jnp.float32),
        "t2_w": t2_w,
        "t2_b": t2_b,
    }


def _run_case(case_key, name, input_size, embed_dim, pos_size,
              B, L1, L2, L3, test_bf16):
    kp, k1, k2, k3, k4 = jax.random.split(case_key, 5)
    params = init_params(kp, input_size, embed_dim, pos_size)

    x1 = jax.random.randint(k1, (B, L1), 0, input_size, dtype=jnp.int32)
    x2 = jax.random.randint(k2, (B, L2), 0, input_size, dtype=jnp.int32)
    x3 = jax.random.randint(k3, (B, L3), 0, pos_size + 1, dtype=jnp.int32)
    x4 = jax.random.uniform(k4, (B, L1), jnp.float32)
    # include padding indices (must contribute zero, matching padding_idx=0)
    x1 = x1.at[0, -1].set(0)
    x2 = x2.at[-1, -1].set(0)

    for use_relu in (False, True):
        out = extdssm_forward(x1, x2, x3, x4, params, use_relu=use_relu)
        out = jax.block_until_ready(out)
        ref = extdssm_reference(x1, x2, x3, x4, params, use_relu=use_relu)
        assert out.shape == (B,), (name, use_relu, out.shape)
        assert jnp.allclose(out, ref, rtol=1e-4, atol=1e-4), (name, use_relu)

    if test_bf16:
        # bf16-table MXU path (v6e/v7x item) -- smoke test with loose tolerance.
        out_bf16 = jax.block_until_ready(
            extdssm_forward(x1, x2, x3, x4, params, use_bf16_table=True))
        ref = extdssm_reference(x1, x2, x3, x4, params)
        assert jnp.allclose(out_bf16, ref, rtol=5e-2, atol=5e-2), (name, "bf16")


if __name__ == "__main__":
    root = jax.random.PRNGKey(0)

    # Small config: single vocab chunk, single batch tile (matches module toy sizes).
    _run_case(jax.random.fold_in(root, 0), "small",
              input_size=32, embed_dim=32, pos_size=16,
              B=2, L1=8, L2=8, L3=1, test_bf16=True)

    # Larger config: exercises the V-chunked accumulation (2 vocab chunks),
    # vocab padding, and a batch size that is not a multiple of the tile.
    _run_case(jax.random.fold_in(root, 1), "chunked",
              input_size=640, embed_dim=64, pos_size=32,
              B=300, L1=8, L2=5, L3=2, test_bf16=False)

    print("KERNEL_OK")
</pallas_src>

<mosaic_0001>
module attributes {stable_mosaic.version = 11 : i64} {
  func.func @_extdssm_kernel(%arg0: i32, %arg1: i32, %arg2: memref<8x1x128xi32, #tpu.memory_space<vmem>>, %arg3: memref<8x1x128xi32, #tpu.memory_space<vmem>>, %arg4: memref<1x1x128xi32, #tpu.memory_space<vmem>>, %arg5: memref<8x1x128xf32, #tpu.memory_space<vmem>>, %arg6: memref<32x32xf32, #tpu.memory_space<vmem>>, %arg7: memref<8x128xf32, #tpu.memory_space<vmem>>, %arg8: memref<32x2xf32, #tpu.memory_space<vmem>>, %arg9: memref<32x32xf32, #tpu.memory_space<vmem>>, %arg10: memref<32x32xf32, #tpu.memory_space<vmem>>, %arg11: memref<32x2xf32, #tpu.memory_space<vmem>>, %arg12: memref<1x128xf32, #tpu.memory_space<vmem>>, %arg13: memref<32x256xf32, #tpu.memory_space<vmem>>, %arg14: memref<32x256xf32, #tpu.memory_space<vmem>>) attributes {dimension_semantics = [#tpu.dimension_semantics<parallel>, #tpu.dimension_semantics<arbitrary>], iteration_bounds = array<i64: 1, 1>, scalar_prefetch = 0 : i64, scratch_operands = 2 : i64, tpu.core_type = #tpu.core_type<tc>, window_params = [{transform_indices = @transform_0, window_bounds = array<i64: 8, 1, 128>}, {transform_indices = @transform_1, window_bounds = array<i64: 8, 1, 128>}, {transform_indices = @transform_2, window_bounds = array<i64: 1, 1, 128>}, {transform_indices = @transform_3, window_bounds = array<i64: 8, 1, 128>}, {transform_indices = @transform_4, window_bounds = array<i64: 32, 32>}, {pipeline_mode = #tpu.pipeline_mode<synchronous>, transform_indices = @transform_5, window_bounds = array<i64: 8, 128>}, {pipeline_mode = #tpu.pipeline_mode<synchronous>, transform_indices = @transform_6, window_bounds = array<i64: 32, 2>}, {pipeline_mode = #tpu.pipeline_mode<synchronous>, transform_indices = @transform_7, window_bounds = array<i64: 32, 32>}, {pipeline_mode = #tpu.pipeline_mode<synchronous>, transform_indices = @transform_8, window_bounds = array<i64: 32, 32>}, {pipeline_mode = #tpu.pipeline_mode<synchronous>, transform_indices = @transform_9, window_bounds = array<i64: 32, 2>}, {transform_indices = @transform_10, window_bounds = array<i64: 1, 128>}]} {
    %0 = tpu.iota {dimensions = array<i32: 0>} : vector<32x1xi32>
    %c32_i32 = arith.constant 32 : i32
    %1 = arith.muli %arg1, %c32_i32 : i32
    %2 = vector.broadcast %1 : i32 to vector<32x1xi32>
    %3 = arith.addi %0, %2 : vector<32x1xi32>
    %cst = arith.constant 0.000000e+00 : f32
    %4 = vector.broadcast %cst : f32 to vector<32x128xf32>
    %c0_i32 = arith.constant 0 : i32
    %5 = arith.index_cast %c0_i32 : i32 to index
    %c0 = arith.constant 0 : index
    %c0_0 = arith.constant 0 : index
    %6 = vector.load %arg2[%5, %c0, %c0_0] : memref<8x1x128xi32, #tpu.memory_space<vmem>>, vector<1x1x128xi32>
    %7 = vector.shape_cast %6 : vector<1x1x128xi32> to vector<1x128xi32>
    %8 = vector.broadcast %3 : vector<32x1xi32> to vector<32x128xi32>
    %9 = vector.broadcast %7 : vector<1x128xi32> to vector<32x128xi32>
    %10 = arith.cmpi eq, %8, %9 : vector<32x128xi32>
    %11 = arith.index_cast %c0_i32 : i32 to index
    %c0_1 = arith.constant 0 : index
    %c0_2 = arith.constant 0 : index
    %12 = vector.load %arg5[%11, %c0_1, %c0_2] : memref<8x1x128xf32, #tpu.memory_space<vmem>>, vector<1x1x128xf32>
    %13 = vector.shape_cast %12 : vector<1x1x128xf32> to vector<1x128xf32>
    %cst_3 = arith.constant 0.000000e+00 : f32
    %14 = vector.shape_cast %13 : vector<1x128xf32> to vector<1x128xf32>
    %15 = vector.broadcast %14 : vector<1x128xf32> to vector<32x128xf32>
    %16 = vector.broadcast %cst_3 : f32 to vector<32x128xf32>
    %17 = arith.select %10, %15, %16 : vector<32x128xi1>, vector<32x128xf32>
    %18 = arith.addf %4, %17 : vector<32x128xf32>
    %c1_i32 = arith.constant 1 : i32
    %19 = arith.index_cast %c1_i32 : i32 to index
    %c0_4 = arith.constant 0 : index
    %c0_5 = arith.constant 0 : index
    %20 = vector.load %arg2[%19, %c0_4, %c0_5] : memref<8x1x128xi32, #tpu.memory_space<vmem>>, vector<1x1x128xi32>
    %21 = vector.shape_cast %20 : vector<1x1x128xi32> to vector<1x128xi32>
    %22 = vector.broadcast %3 : vector<32x1xi32> to vector<32x128xi32>
    %23 = vector.broadcast %21 : vector<1x128xi32> to vector<32x128xi32>
    %24 = arith.cmpi eq, %22, %23 : vector<32x128xi32>
    %25 = arith.index_cast %c1_i32 : i32 to index
    %c0_6 = arith.constant 0 : index
    %c0_7 = arith.constant 0 : index
    %26 = vector.load %arg5[%25, %c0_6, %c0_7] : memref<8x1x128xf32, #tpu.memory_space<vmem>>, vector<1x1x128xf32>
    %27 = vector.shape_cast %26 : vector<1x1x128xf32> to vector<1x128xf32>
    %cst_8 = arith.constant 0.000000e+00 : f32
    %28 = vector.shape_cast %27 : vector<1x128xf32> to vector<1x128xf32>
    %29 = vector.broadcast %28 : vector<1x128xf32> to vector<32x128xf32>
    %30 = vector.broadcast %cst_8 : f32 to vector<32x128xf32>
    %31 = arith.select %24, %29, %30 : vector<32x128xi1>, vector<32x128xf32>
    %32 = arith.addf %18, %31 : vector<32x128xf32>
    %c2_i32 = arith.constant 2 : i32
    %33 = arith.index_cast %c2_i32 : i32 to index
    %c0_9 = arith.constant 0 : index
    %c0_10 = arith.constant 0 : index
    %34 = vector.load %arg2[%33, %c0_9, %c0_10] : memref<8x1x128xi32, #tpu.memory_space<vmem>>, vector<1x1x128xi32>
    %35 = vector.shape_cast %34 : vector<1x1x128xi32> to vector<1x128xi32>
    %36 = vector.broadcast %3 : vector<32x1xi32> to vector<32x128xi32>
    %37 = vector.broadcast %35 : vector<1x128xi32> to vector<32x128xi32>
    %38 = arith.cmpi eq, %36, %37 : vector<32x128xi32>
    %39 = arith.index_cast %c2_i32 : i32 to index
    %c0_11 = arith.constant 0 : index
    %c0_12 = arith.constant 0 : index
    %40 = vector.load %arg5[%39, %c0_11, %c0_12] : memref<8x1x128xf32, #tpu.memory_space<vmem>>, vector<1x1x128xf32>
    %41 = vector.shape_cast %40 : vector<1x1x128xf32> to vector<1x128xf32>
    %cst_13 = arith.constant 0.000000e+00 : f32
    %42 = vector.shape_cast %41 : vector<1x128xf32> to vector<1x128xf32>
    %43 = vector.broadcast %42 : vector<1x128xf32> to vector<32x128xf32>
    %44 = vector.broadcast %cst_13 : f32 to vector<32x128xf32>
    %45 = arith.select %38, %43, %44 : vector<32x128xi1>, vector<32x128xf32>
    %46 = arith.addf %32, %45 : vector<32x128xf32>
    %c3_i32 = arith.constant 3 : i32
    %47 = arith.index_cast %c3_i32 : i32 to index
    %c0_14 = arith.constant 0 : index
    %c0_15 = arith.constant 0 : index
    %48 = vector.load %arg2[%47, %c0_14, %c0_15] : memref<8x1x128xi32, #tpu.memory_space<vmem>>, vector<1x1x128xi32>
    %49 = vector.shape_cast %48 : vector<1x1x128xi32> to vector<1x128xi32>
    %50 = vector.broadcast %3 : vector<32x1xi32> to vector<32x128xi32>
    %51 = vector.broadcast %49 : vector<1x128xi32> to vector<32x128xi32>
    %52 = arith.cmpi eq, %50, %51 : vector<32x128xi32>
    %53 = arith.index_cast %c3_i32 : i32 to index
    %c0_16 = arith.constant 0 : index
    %c0_17 = arith.constant 0 : index
    %54 = vector.load %arg5[%53, %c0_16, %c0_17] : memref<8x1x128xf32, #tpu.memory_space<vmem>>, vector<1x1x128xf32>
    %55 = vector.shape_cast %54 : vector<1x1x128xf32> to vector<1x128xf32>
    %cst_18 = arith.constant 0.000000e+00 : f32
    %56 = vector.shape_cast %55 : vector<1x128xf32> to vector<1x128xf32>
    %57 = vector.broadcast %56 : vector<1x128xf32> to vector<32x128xf32>
    %58 = vector.broadcast %cst_18 : f32 to vector<32x128xf32>
    %59 = arith.select %52, %57, %58 : vector<32x128xi1>, vector<32x128xf32>
    %60 = arith.addf %46, %59 : vector<32x128xf32>
    %c4_i32 = arith.constant 4 : i32
    %61 = arith.index_cast %c4_i32 : i32 to index
    %c0_19 = arith.constant 0 : index
    %c0_20 = arith.constant 0 : index
    %62 = vector.load %arg2[%61, %c0_19, %c0_20] : memref<8x1x128xi32, #tpu.memory_space<vmem>>, vector<1x1x128xi32>
    %63 = vector.shape_cast %62 : vector<1x1x128xi32> to vector<1x128xi32>
    %64 = vector.broadcast %3 : vector<32x1xi32> to vector<32x128xi32>
    %65 = vector.broadcast %63 : vector<1x128xi32> to vector<32x128xi32>
    %66 = arith.cmpi eq, %64, %65 : vector<32x128xi32>
    %67 = arith.index_cast %c4_i32 : i32 to index
    %c0_21 = arith.constant 0 : index
    %c0_22 = arith.constant 0 : index
    %68 = vector.load %arg5[%67, %c0_21, %c0_22] : memref<8x1x128xf32, #tpu.memory_space<vmem>>, vector<1x1x128xf32>
    %69 = vector.shape_cast %68 : vector<1x1x128xf32> to vector<1x128xf32>
    %cst_23 = arith.constant 0.000000e+00 : f32
    %70 = vector.shape_cast %69 : vector<1x128xf32> to vector<1x128xf32>
    %71 = vector.broadcast %70 : vector<1x128xf32> to vector<32x128xf32>
    %72 = vector.broadcast %cst_23 : f32 to vector<32x128xf32>
    %73 = arith.select %66, %71, %72 : vector<32x128xi1>, vector<32x128xf32>
    %74 = arith.addf %60, %73 : vector<32x128xf32>
    %c5_i32 = arith.constant 5 : i32
    %75 = arith.index_cast %c5_i32 : i32 to index
    %c0_24 = arith.constant 0 : index
    %c0_25 = arith.constant 0 : index
    %76 = vector.load %arg2[%75, %c0_24, %c0_25] : memref<8x1x128xi32, #tpu.memory_space<vmem>>, vector<1x1x128xi32>
    %77 = vector.shape_cast %76 : vector<1x1x128xi32> to vector<1x128xi32>
    %78 = vector.broadcast %3 : vector<32x1xi32> to vector<32x128xi32>
    %79 = vector.broadcast %77 : vector<1x128xi32> to vector<32x128xi32>
    %80 = arith.cmpi eq, %78, %79 : vector<32x128xi32>
    %81 = arith.index_cast %c5_i32 : i32 to index
    %c0_26 = arith.constant 0 : index
    %c0_27 = arith.constant 0 : index
    %82 = vector.load %arg5[%81, %c0_26, %c0_27] : memref<8x1x128xf32, #tpu.memory_space<vmem>>, vector<1x1x128xf32>
    %83 = vector.shape_cast %82 : vector<1x1x128xf32> to vector<1x128xf32>
    %cst_28 = arith.constant 0.000000e+00 : f32
    %84 = vector.shape_cast %83 : vector<1x128xf32> to vector<1x128xf32>
    %85 = vector.broadcast %84 : vector<1x128xf32> to vector<32x128xf32>
    %86 = vector.broadcast %cst_28 : f32 to vector<32x128xf32>
    %87 = arith.select %80, %85, %86 : vector<32x128xi1>, vector<32x128xf32>
    %88 = arith.addf %74, %87 : vector<32x128xf32>
    %c6_i32 = arith.constant 6 : i32
    %89 = arith.index_cast %c6_i32 : i32 to index
    %c0_29 = arith.constant 0 : index
    %c0_30 = arith.constant 0 : index
    %90 = vector.load %arg2[%89, %c0_29, %c0_30] : memref<8x1x128xi32, #tpu.memory_space<vmem>>, vector<1x1x128xi32>
    %91 = vector.shape_cast %90 : vector<1x1x128xi32> to vector<1x128xi32>
    %92 = vector.broadcast %3 : vector<32x1xi32> to vector<32x128xi32>
    %93 = vector.broadcast %91 : vector<1x128xi32> to vector<32x128xi32>
    %94 = arith.cmpi eq, %92, %93 : vector<32x128xi32>
    %95 = arith.index_cast %c6_i32 : i32 to index
    %c0_31 = arith.constant 0 : index
    %c0_32 = arith.constant 0 : index
    %96 = vector.load %arg5[%95, %c0_31, %c0_32] : memref<8x1x128xf32, #tpu.memory_space<vmem>>, vector<1x1x128xf32>
    %97 = vector.shape_cast %96 : vector<1x1x128xf32> to vector<1x128xf32>
    %cst_33 = arith.constant 0.000000e+00 : f32
    %98 = vector.shape_cast %97 : vector<1x128xf32> to vector<1x128xf32>
    %99 = vector.broadcast %98 : vector<1x128xf32> to vector<32x128xf32>
    %100 = vector.broadcast %cst_33 : f32 to vector<32x128xf32>
    %101 = arith.select %94, %99, %100 : vector<32x128xi1>, vector<32x128xf32>
    %102 = arith.addf %88, %101 : vector<32x128xf32>
    %c7_i32 = arith.constant 7 : i32
    %103 = arith.index_cast %c7_i32 : i32 to index
    %c0_34 = arith.constant 0 : index
    %c0_35 = arith.constant 0 : index
    %104 = vector.load %arg2[%103, %c0_34, %c0_35] : memref<8x1x128xi32, #tpu.memory_space<vmem>>, vector<1x1x128xi32>
    %105 = vector.shape_cast %104 : vector<1x1x128xi32> to vector<1x128xi32>
    %106 = vector.broadcast %3 : vector<32x1xi32> to vector<32x128xi32>
    %107 = vector.broadcast %105 : vector<1x128xi32> to vector<32x128xi32>
    %108 = arith.cmpi eq, %106, %107 : vector<32x128xi32>
    %109 = arith.index_cast %c7_i32 : i32 to index
    %c0_36 = arith.constant 0 : index
    %c0_37 = arith.constant 0 : index
    %110 = vector.load %arg5[%109, %c0_36, %c0_37] : memref<8x1x128xf32, #tpu.memory_space<vmem>>, vector<1x1x128xf32>
    %111 = vector.shape_cast %110 : vector<1x1x128xf32> to vector<1x128xf32>
    %cst_38 = arith.constant 0.000000e+00 : f32
    %112 = vector.shape_cast %111 : vector<1x128xf32> to vector<1x128xf32>
    %113 = vector.broadcast %112 : vector<1x128xf32> to vector<32x128xf32>
    %114 = vector.broadcast %cst_38 : f32 to vector<32x128xf32>
    %115 = arith.select %108, %113, %114 : vector<32x128xi1>, vector<32x128xf32>
    %116 = arith.addf %102, %115 : vector<32x128xf32>
    %c8_i32 = arith.constant 8 : i32
    %c0_39 = arith.constant 0 : index
    %c0_40 = arith.constant 0 : index
    %117 = vector.load %arg13[%c0_39, %c0_40] : memref<32x256xf32, #tpu.memory_space<vmem>>, vector<32x128xf32>
    tpu.vector_store %arg13[%c0_39, %c0_40], %116 {strides = array<i32>} : memref<32x256xf32, #tpu.memory_space<vmem>>, vector<32x128xf32>,
    %c0_i32_41 = arith.constant 0 : i32
    %118 = arith.index_cast %c0_i32_41 : i32 to index
    %c0_42 = arith.constant 0 : index
    %c0_43 = arith.constant 0 : index
    %119 = vector.load %arg3[%118, %c0_42, %c0_43] : memref<8x1x128xi32, #tpu.memory_space<vmem>>, vector<1x1x128xi32>
    %120 = vector.shape_cast %119 : vector<1x1x128xi32> to vector<1x128xi32>
    %121 = vector.broadcast %3 : vector<32x1xi32> to vector<32x128xi32>
    %122 = vector.broadcast %120 : vector<1x128xi32> to vector<32x128xi32>
    %123 = arith.cmpi eq, %121, %122 : vector<32x128xi32>
    %cst_44 = arith.constant 1.000000e+00 : f32
    %cst_45 = arith.constant 0.000000e+00 : f32
    %124 = vector.broadcast %cst_44 : f32 to vector<32x128xf32>
    %125 = vector.broadcast %cst_45 : f32 to vector<32x128xf32>
    %126 = arith.select %123, %124, %125 : vector<32x128xi1>, vector<32x128xf32>
    %127 = arith.addf %4, %126 : vector<32x128xf32>
    %c1_i32_46 = arith.constant 1 : i32
    %128 = arith.index_cast %c1_i32_46 : i32 to index
    %c0_47 = arith.constant 0 : index
    %c0_48 = arith.constant 0 : index
    %129 = vector.load %arg3[%128, %c0_47, %c0_48] : memref<8x1x128xi32, #tpu.memory_space<vmem>>, vector<1x1x128xi32>
    %130 = vector.shape_cast %129 : vector<1x1x128xi32> to vector<1x128xi32>
    %131 = vector.broadcast %3 : vector<32x1xi32> to vector<32x128xi32>
    %132 = vector.broadcast %130 : vector<1x128xi32> to vector<32x128xi32>
    %133 = arith.cmpi eq, %131, %132 : vector<32x128xi32>
    %cst_49 = arith.constant 1.000000e+00 : f32
    %cst_50 = arith.constant 0.000000e+00 : f32
    %134 = vector.broadcast %cst_49 : f32 to vector<32x128xf32>
    %135 = vector.broadcast %cst_50 : f32 to vector<32x128xf32>
    %136 = arith.select %133, %134, %135 : vector<32x128xi1>, vector<32x128xf32>
    %137 = arith.addf %127, %136 : vector<32x128xf32>
    %c2_i32_51 = arith.constant 2 : i32
    %138 = arith.index_cast %c2_i32_51 : i32 to index
    %c0_52 = arith.constant 0 : index
    %c0_53 = arith.constant 0 : index
    %139 = vector.load %arg3[%138, %c0_52, %c0_53] : memref<8x1x128xi32, #tpu.memory_space<vmem>>, vector<1x1x128xi32>
    %140 = vector.shape_cast %139 : vector<1x1x128xi32> to vector<1x128xi32>
    %141 = vector.broadcast %3 : vector<32x1xi32> to vector<32x128xi32>
    %142 = vector.broadcast %140 : vector<1x128xi32> to vector<32x128xi32>
    %143 = arith.cmpi eq, %141, %142 : vector<32x128xi32>
    %cst_54 = arith.constant 1.000000e+00 : f32
    %cst_55 = arith.constant 0.000000e+00 : f32
    %144 = vector.broadcast %cst_54 : f32 to vector<32x128xf32>
    %145 = vector.broadcast %cst_55 : f32 to vector<32x128xf32>
    %146 = arith.select %143, %144, %145 : vector<32x128xi1>, vector<32x128xf32>
    %147 = arith.addf %137, %146 : vector<32x128xf32>
    %c3_i32_56 = arith.constant 3 : i32
    %148 = arith.index_cast %c3_i32_56 : i32 to index
    %c0_57 = arith.constant 0 : index
    %c0_58 = arith.constant 0 : index
    %149 = vector.load %arg3[%148, %c0_57, %c0_58] : memref<8x1x128xi32, #tpu.memory_space<vmem>>, vector<1x1x128xi32>
    %150 = vector.shape_cast %149 : vector<1x1x128xi32> to vector<1x128xi32>
    %151 = vector.broadcast %3 : vector<32x1xi32> to vector<32x128xi32>
    %152 = vector.broadcast %150 : vector<1x128xi32> to vector<32x128xi32>
    %153 = arith.cmpi eq, %151, %152 : vector<32x128xi32>
    %cst_59 = arith.constant 1.000000e+00 : f32
    %cst_60 = arith.constant 0.000000e+00 : f32
    %154 = vector.broadcast %cst_59 : f32 to vector<32x128xf32>
    %155 = vector.broadcast %cst_60 : f32 to vector<32x128xf32>
    %156 = arith.select %153, %154, %155 : vector<32x128xi1>, vector<32x128xf32>
    %157 = arith.addf %147, %156 : vector<32x128xf32>
    %c4_i32_61 = arith.constant 4 : i32
    %158 = arith.index_cast %c4_i32_61 : i32 to index
    %c0_62 = arith.constant 0 : index
    %c0_63 = arith.constant 0 : index
    %159 = vector.load %arg3[%158, %c0_62, %c0_63] : memref<8x1x128xi32, #tpu.memory_space<vmem>>, vector<1x1x128xi32>
    %160 = vector.shape_cast %159 : vector<1x1x128xi32> to vector<1x128xi32>
    %161 = vector.broadcast %3 : vector<32x1xi32> to vector<32x128xi32>
    %162 = vector.broadcast %160 : vector<1x128xi32> to vector<32x128xi32>
    %163 = arith.cmpi eq, %161, %162 : vector<32x128xi32>
    %cst_64 = arith.constant 1.000000e+00 : f32
    %cst_65 = arith.constant 0.000000e+00 : f32
    %164 = vector.broadcast %cst_64 : f32 to vector<32x128xf32>
    %165 = vector.broadcast %cst_65 : f32 to vector<32x128xf32>
    %166 = arith.select %163, %164, %165 : vector<32x128xi1>, vector<32x128xf32>
    %167 = arith.addf %157, %166 : vector<32x128xf32>
    %c5_i32_66 = arith.constant 5 : i32
    %168 = arith.index_cast %c5_i32_66 : i32 to index
    %c0_67 = arith.constant 0 : index
    %c0_68 = arith.constant 0 : index
    %169 = vector.load %arg3[%168, %c0_67, %c0_68] : memref<8x1x128xi32, #tpu.memory_space<vmem>>, vector<1x1x128xi32>
    %170 = vector.shape_cast %169 : vector<1x1x128xi32> to vector<1x128xi32>
    %171 = vector.broadcast %3 : vector<32x1xi32> to vector<32x128xi32>
    %172 = vector.broadcast %170 : vector<1x128xi32> to vector<32x128xi32>
    %173 = arith.cmpi eq, %171, %172 : vector<32x128xi32>
    %cst_69 = arith.constant 1.000000e+00 : f32
    %cst_70 = arith.constant 0.000000e+00 : f32
    %174 = vector.broadcast %cst_69 : f32 to vector<32x128xf32>
    %175 = vector.broadcast %cst_70 : f32 to vector<32x128xf32>
    %176 = arith.select %173, %174, %175 : vector<32x128xi1>, vector<32x128xf32>
    %177 = arith.addf %167, %176 : vector<32x128xf32>
    %c6_i32_71 = arith.constant 6 : i32
    %178 = arith.index_cast %c6_i32_71 : i32 to index
    %c0_72 = arith.constant 0 : index
    %c0_73 = arith.constant 0 : index
    %179 = vector.load %arg3[%178, %c0_72, %c0_73] : memref<8x1x128xi32, #tpu.memory_space<vmem>>, vector<1x1x128xi32>
    %180 = vector.shape_cast %179 : vector<1x1x128xi32> to vector<1x128xi32>
    %181 = vector.broadcast %3 : vector<32x1xi32> to vector<32x128xi32>
    %182 = vector.broadcast %180 : vector<1x128xi32> to vector<32x128xi32>
    %183 = arith.cmpi eq, %181, %182 : vector<32x128xi32>
    %cst_74 = arith.constant 1.000000e+00 : f32
    %cst_75 = arith.constant 0.000000e+00 : f32
    %184 = vector.broadcast %cst_74 : f32 to vector<32x128xf32>
    %185 = vector.broadcast %cst_75 : f32 to vector<32x128xf32>
    %186 = arith.select %183, %184, %185 : vector<32x128xi1>, vector<32x128xf32>
    %187 = arith.addf %177, %186 : vector<32x128xf32>
    %c7_i32_76 = arith.constant 7 : i32
    %188 = arith.index_cast %c7_i32_76 : i32 to index
    %c0_77 = arith.constant 0 : index
    %c0_78 = arith.constant 0 : index
    %189 = vector.load %arg3[%188, %c0_77, %c0_78] : memref<8x1x128xi32, #tpu.memory_space<vmem>>, vector<1x1x128xi32>
    %190 = vector.shape_cast %189 : vector<1x1x128xi32> to vector<1x128xi32>
    %191 = vector.broadcast %3 : vector<32x1xi32> to vector<32x128xi32>
    %192 = vector.broadcast %190 : vector<1x128xi32> to vector<32x128xi32>
    %193 = arith.cmpi eq, %191, %192 : vector<32x128xi32>
    %cst_79 = arith.constant 1.000000e+00 : f32
    %cst_80 = arith.constant 0.000000e+00 : f32
    %194 = vector.broadcast %cst_79 : f32 to vector<32x128xf32>
    %195 = vector.broadcast %cst_80 : f32 to vector<32x128xf32>
    %196 = arith.select %193, %194, %195 : vector<32x128xi1>, vector<32x128xf32>
    %197 = arith.addf %187, %196 : vector<32x128xf32>
    %c8_i32_81 = arith.constant 8 : i32
    %c0_82 = arith.constant 0 : index
    %c128 = arith.constant 128 : index
    %198 = vector.load %arg13[%c0_82, %c128] : memref<32x256xf32, #tpu.memory_space<vmem>>, vector<32x128xf32>
    tpu.vector_store %arg13[%c0_82, %c128], %197 {strides = array<i32>} : memref<32x256xf32, #tpu.memory_space<vmem>>, vector<32x128xf32>,
    %c0_83 = arith.constant 0 : index
    %c0_84 = arith.constant 0 : index
    %199 = vector.load %arg6[%c0_83, %c0_84] : memref<32x32xf32, #tpu.memory_space<vmem>>, vector<32x32xf32>
    %c0_85 = arith.constant 0 : index
    %c0_86 = arith.constant 0 : index
    %200 = vector.load %arg13[%c0_85, %c0_86] : memref<32x256xf32, #tpu.memory_space<vmem>>, vector<32x256xf32>
    %cst_87 = arith.constant dense<0.000000e+00> : vector<32x256xf32>
    %201 = tpu.matmul %199, %200, %cst_87 {dimension_numbers = #tpu.dot_dimension_numbers<[1], [0], [0], [1], [0, 0, 1, 1], [], []>} : vector<32x32xf32>, vector<32x256xf32>, vector<32x256xf32> -> vector<32x256xf32>
    %c0_i32_88 = arith.constant 0 : i32
    %202 = arith.cmpi eq, %arg1, %c0_i32_88 : i32
    %203 = arith.extui %202 : i1 to i32
    %c0_i32_89 = arith.constant 0 : i32
    %204 = arith.cmpi ne, %203, %c0_i32_89 : i32
    scf.if %204 {
      %cst_96 = arith.constant 0.000000e+00 : f32
      %211 = vector.broadcast %cst_96 : f32 to vector<32x256xf32>
      %c0_97 = arith.constant 0 : index
      %c0_98 = arith.constant 0 : index
      %212 = vector.load %arg14[%c0_97, %c0_98] : memref<32x256xf32, #tpu.memory_space<vmem>>, vector<32x256xf32>
      tpu.vector_store %arg14[%c0_97, %c0_98], %211 {strides = array<i32>} : memref<32x256xf32, #tpu.memory_space<vmem>>, vector<32x256xf32>,
    } else {
    }
    %c0_90 = arith.constant 0 : index
    %c0_91 = arith.constant 0 : index
    %205 = vector.load %arg14[%c0_90, %c0_91] : memref<32x256xf32, #tpu.memory_space<vmem>>, vector<32x256xf32>
    %206 = arith.addf %205, %201 : vector<32x256xf32>
    %c0_92 = arith.constant 0 : index
    %c0_93 = arith.constant 0 : index
    %207 = vector.load %arg14[%c0_92, %c0_93] : memref<32x256xf32, #tpu.memory_space<vmem>>, vector<32x256xf32>
    tpu.vector_store %arg14[%c0_92, %c0_93], %206 {strides = array<i32>} : memref<32x256xf32, #tpu.memory_space<vmem>>, vector<32x256xf32>,
    %c0_i32_94 = arith.constant 0 : i32
    %208 = arith.cmpi eq, %arg1, %c0_i32_94 : i32
    %209 = arith.extui %208 : i1 to i32
    %c0_i32_95 = arith.constant 0 : i32
    %210 = arith.cmpi ne, %209, %c0_i32_95 : i32
    scf.if %210 {
      %c0_96 = arith.constant 0 : index
      %c0_97 = arith.constant 0 : index
      %211 = vector.load %arg8[%c0_96, %c0_97] : memref<32x2xf32, #tpu.memory_space<vmem>>, vector<32x2xf32>
      %c0_98 = arith.constant 0 : index
      %c0_99 = arith.constant 0 : index
      %212 = vector.load %arg11[%c0_98, %c0_99] : memref<32x2xf32, #tpu.memory_space<vmem>>, vector<32x2xf32>
      %c0_100 = arith.constant 0 : index
      %c0_101 = arith.constant 0 : index
      %213 = vector.load %arg14[%c0_100, %c0_101] : memref<32x256xf32, #tpu.memory_space<vmem>>, vector<32x128xf32>
      %214 = vector.extract_strided_slice %211 {offsets = [0, 0], sizes = [32, 1], strides = [1, 1]} : vector<32x2xf32> to vector<32x1xf32>
      %215 = vector.broadcast %214 : vector<32x1xf32> to vector<32x128xf32>
      %216 = arith.addf %213, %215 : vector<32x128xf32>
      %217 = math.tanh %216 : vector<32x128xf32>
      %c0_102 = arith.constant 0 : index
      %c128_103 = arith.constant 128 : index
      %218 = vector.load %arg14[%c0_102, %c128_103] : memref<32x256xf32, #tpu.memory_space<vmem>>, vector<32x128xf32>
      %219 = vector.extract_strided_slice %211 {offsets = [0, 1], sizes = [32, 1], strides = [1, 1]} : vector<32x2xf32> to vector<32x1xf32>
      %220 = vector.broadcast %219 : vector<32x1xf32> to vector<32x128xf32>
      %221 = arith.addf %218, %220 : vector<32x128xf32>
      %222 = math.tanh %221 : vector<32x128xf32>
      %c0_104 = arith.constant 0 : index
      %c0_105 = arith.constant 0 : index
      %223 = vector.load %arg9[%c0_104, %c0_105] : memref<32x32xf32, #tpu.memory_space<vmem>>, vector<32x32xf32>
      %cst_106 = arith.constant dense<0.000000e+00> : vector<32x128xf32>
      %224 = tpu.matmul %223, %217, %cst_106 {dimension_numbers = #tpu.dot_dimension_numbers<[1], [0], [0], [1], [0, 0, 1, 1], [], []>} : vector<32x32xf32>, vector<32x128xf32>, vector<32x128xf32> -> vector<32x128xf32>
      %225 = vector.extract_strided_slice %212 {offsets = [0, 0], sizes = [32, 1], strides = [1, 1]} : vector<32x2xf32> to vector<32x1xf32>
      %226 = vector.broadcast %225 : vector<32x1xf32> to vector<32x128xf32>
      %227 = arith.addf %224, %226 : vector<32x128xf32>
      %228 = math.tanh %227 : vector<32x128xf32>
      %c0_107 = arith.constant 0 : index
      %c0_108 = arith.constant 0 : index
      %229 = vector.load %arg10[%c0_107, %c0_108] : memref<32x32xf32, #tpu.memory_space<vmem>>, vector<32x32xf32>
      %cst_109 = arith.constant dense<0.000000e+00> : vector<32x128xf32>
      %230 = tpu.matmul %229, %222, %cst_109 {dimension_numbers = #tpu.dot_dimension_numbers<[1], [0], [0], [1], [0, 0, 1, 1], [], []>} : vector<32x32xf32>, vector<32x128xf32>, vector<32x128xf32> -> vector<32x128xf32>
      %231 = vector.extract_strided_slice %212 {offsets = [0, 1], sizes = [32, 1], strides = [1, 1]} : vector<32x2xf32> to vector<32x1xf32>
      %232 = vector.broadcast %231 : vector<32x1xf32> to vector<32x128xf32>
      %233 = arith.addf %230, %232 : vector<32x128xf32>
      %234 = math.tanh %233 : vector<32x128xf32>
      %235 = arith.mulf %228, %234 : vector<32x128xf32>
      %cst_110 = arith.constant dense<0.000000e+00> : vector<128xf32>
      %236 = vector.multi_reduction <add>, %235, %cst_110 [0] : vector<32x128xf32> to vector<128xf32>
      %237 = vector.shape_cast %236 : vector<128xf32> to vector<1x128xf32>
      %238 = tpu.iota {dimensions = array<i32: 0>} : vector<128x1xi32>
      %cst_111 = arith.constant 0.000000e+00 : f32
      %239 = vector.broadcast %cst_111 : f32 to vector<128x128xf32>
      %c0_i32_112 = arith.constant 0 : i32
      %240 = arith.index_cast %c0_i32_112 : i32 to index
      %c0_113 = arith.constant 0 : index
      %c0_114 = arith.constant 0 : index
      %241 = vector.load %arg4[%240, %c0_113, %c0_114] : memref<1x1x128xi32, #tpu.memory_space<vmem>>, vector<1x1x128xi32>
      %242 = vector.shape_cast %241 : vector<1x1x128xi32> to vector<1x128xi32>
      %243 = vector.broadcast %238 : vector<128x1xi32> to vector<128x128xi32>
      %244 = vector.broadcast %242 : vector<1x128xi32> to vector<128x128xi32>
      %245 = arith.cmpi eq, %243, %244 : vector<128x128xi32>
      %cst_115 = arith.constant 1.000000e+00 : f32
      %cst_116 = arith.constant 0.000000e+00 : f32
      %246 = vector.broadcast %cst_115 : f32 to vector<128x128xf32>
      %247 = vector.broadcast %cst_116 : f32 to vector<128x128xf32>
      %248 = arith.select %245, %246, %247 : vector<128x128xi1>, vector<128x128xf32>
      %249 = arith.addf %239, %248 : vector<128x128xf32>
      %c1_i32_117 = arith.constant 1 : i32
      %c0_118 = arith.constant 0 : index
      %c0_119 = arith.constant 0 : index
      %250 = vector.load %arg7[%c0_118, %c0_119] : memref<8x128xf32, #tpu.memory_space<vmem>>, vector<8x128xf32>
      %cst_120 = arith.constant dense<0.000000e+00> : vector<8x128xf32>
      %251 = tpu.matmul %250, %249, %cst_120 {dimension_numbers = #tpu.dot_dimension_numbers<[1], [0], [0], [1], [0, 0, 1, 1], [], []>} : vector<8x128xf32>, vector<128x128xf32>, vector<8x128xf32> -> vector<8x128xf32>
      %252 = vector.extract_strided_slice %251 {offsets = [0, 0], sizes = [1, 128], strides = [1, 1]} : vector<8x128xf32> to vector<1x128xf32>
      %253 = arith.addf %237, %252 : vector<1x128xf32>
      %254 = arith.negf %253 : vector<1x128xf32>
      %255 = math.exp %254 : vector<1x128xf32>
      %cst_121 = arith.constant 1.000000e+00 : f32
      %256 = vector.broadcast %cst_121 : f32 to vector<1x128xf32>
      %257 = arith.addf %256, %255 : vector<1x128xf32>
      %258 = arith.divf %256, %257 : vector<1x128xf32>
      %c0_122 = arith.constant 0 : index
      %c0_123 = arith.constant 0 : index
      %259 = vector.load %arg12[%c0_122, %c0_123] : memref<1x128xf32, #tpu.memory_space<vmem>>, vector<1x128xf32>
      tpu.vector_store %arg12[%c0_122, %c0_123], %258 {strides = array<i32>} : memref<1x128xf32, #tpu.memory_space<vmem>>, vector<1x128xf32>,
    } else {
    }
    return
  }
  func.func @transform_0(%arg0: i32, %arg1: i32) -> (i32, i32, i32) {
    %c0_i32 = arith.constant 0 : i32
    %c0_i32_0 = arith.constant 0 : i32
    %c0_i32_1 = arith.constant 0 : i32
    return %c0_i32, %c0_i32_0, %arg0 : i32, i32, i32
  }
  func.func @transform_1(%arg0: i32, %arg1: i32) -> (i32, i32, i32) {
    %c0_i32 = arith.constant 0 : i32
    %c0_i32_0 = arith.constant 0 : i32
    %c0_i32_1 = arith.constant 0 : i32
    return %c0_i32, %c0_i32_0, %arg0 : i32, i32, i32
  }
  func.func @transform_2(%arg0: i32, %arg1: i32) -> (i32, i32, i32) {
    %c0_i32 = arith.constant 0 : i32
    %c0_i32_0 = arith.constant 0 : i32
    %c0_i32_1 = arith.constant 0 : i32
    return %c0_i32, %c0_i32_0, %arg0 : i32, i32, i32
  }
  func.func @transform_3(%arg0: i32, %arg1: i32) -> (i32, i32, i32) {
    %c0_i32 = arith.constant 0 : i32
    %c0_i32_0 = arith.constant 0 : i32
    %c0_i32_1 = arith.constant 0 : i32
    return %c0_i32, %c0_i32_0, %arg0 : i32, i32, i32
  }
  func.func @transform_4(%arg0: i32, %arg1: i32) -> (i32, i32) {
    %c0_i32 = arith.constant 0 : i32
    %c0_i32_0 = arith.constant 0 : i32
    return %c0_i32, %arg1 : i32, i32
  }
  func.func @transform_5(%arg0: i32, %arg1: i32) -> (i32, i32) {
    %c0_i32 = arith.constant 0 : i32
    %c0_i32_0 = arith.constant 0 : i32
    %c0_i32_1 = arith.constant 0 : i32
    return %c0_i32, %c0_i32_0 : i32, i32
  }
  func.func @transform_6(%arg0: i32, %arg1: i32) -> (i32, i32) {
    %c0_i32 = arith.constant 0 : i32
    %c0_i32_0 = arith.constant 0 : i32
    %c0_i32_1 = arith.constant 0 : i32
    return %c0_i32, %c0_i32_0 : i32, i32
  }
  func.func @transform_7(%arg0: i32, %arg1: i32) -> (i32, i32) {
    %c0_i32 = arith.constant 0 : i32
    %c0_i32_0 = arith.constant 0 : i32
    %c0_i32_1 = arith.constant 0 : i32
    return %c0_i32, %c0_i32_0 : i32, i32
  }
  func.func @transform_8(%arg0: i32, %arg1: i32) -> (i32, i32) {
    %c0_i32 = arith.constant 0 : i32
    %c0_i32_0 = arith.constant 0 : i32
    %c0_i32_1 = arith.constant 0 : i32
    return %c0_i32, %c0_i32_0 : i32, i32
  }
  func.func @transform_9(%arg0: i32, %arg1: i32) -> (i32, i32) {
    %c0_i32 = arith.constant 0 : i32
    %c0_i32_0 = arith.constant 0 : i32
    %c0_i32_1 = arith.constant 0 : i32
    return %c0_i32, %c0_i32_0 : i32, i32
  }
  func.func @transform_10(%arg0: i32, %arg1: i32) -> (i32, i32) {
    %c0_i32 = arith.constant 0 : i32
    %c0_i32_0 = arith.constant 0 : i32
    return %c0_i32, %arg0 : i32, i32
  }
}

</mosaic_0001>

<bundles_post_ra>
// kernel: tpu_custom_call.1
= control target key start
LH: loop header
LB: loop body
LE: loop exit
PB: predicated region body
PF: predicated region fallthrough
CT: control target
= control target key end

     0   :  { %15 = vsyncpa [#allocation5], 0  ;;  %s1953_s0 = inlined_call_operand.hbm [shape: s32[8,1,128], index: 0, kind: input, shape index: {}]   ;;  %s1954_s1 = inlined_call_operand.hbm [shape: s32[8,1,128], index: 1, kind: input, shape index: {}]   ;;  %s1955_s2 = inlined_call_operand.vmem [shape: s32[1,1,128], index: 2, kind: input, shape index: {}]   ;;  %s1956_s3 = inlined_call_operand.vmem [shape: f32[8,1,128], index: 3, kind: input, shape index: {}]   ;;  %s1957_s4 = inlined_call_operand.vmem [shape: f32[32,32], index: 4, kind: input, shape index: {}]   ;;  %s1958_s5 = inlined_call_operand.hbm [shape: f32[8,128], index: 5, kind: input, shape index: {}]   ;;  %s1959_s6 = inlined_call_operand.vmem [shape: f32[32,2], index: 6, kind: input, shape index: {}]   ;;  %s1960_s7 = inlined_call_operand.vmem [shape: f32[32,32], index: 7, kind: input, shape index: {}]   ;;  %s1961_s8 = inlined_call_operand.hbm [shape: f32[32,32], index: 8, kind: input, shape index: {}]   ;;  %s1962_s9 = inlined_call_operand.vmem [shape: f32[32,2], index: 9, kind: input, shape index: {}]   ;;  %s1963_s10 = inlined_call_operand.hbm [shape: f32[1,128], index: 10, kind: output, shape index: {}]  }
   0x1   :  { %16 = vsyncpa [#allocation8], 0 }
   0x2   :  { %17 = vsyncpa [#allocation11], 0 }
   0x3   :  { %18 = vsyncpa [#allocation6], 0  ;;  %s1421_s13 = smov [#allocation7]   ;;  %s1422_s15 = smov [#allocation4]  }
   0x4   :  { %s36_s14 = sshll.u32 %s1421_s13, 4  ;;  %s24_s16 = sshll.u32 %s1422_s15, 4  ;;  %s37_s14 = int_to_ptr.vmem [resolvable:$true] %s36_s14  ;;  %s25_s16 = int_to_ptr.vmem [resolvable:$true] %s24_s16 }
   0x5   :  { %s1321_s17 = scalar_lea.vmem %s37_s14, 128  ;;  %p1326_p1 = scmp.lt.s32.totalorder %s37_s14, %s37_s14 }
   0x6   :  { %p1322_p0 = scmp.ne.s32.totalorder %s37_s14, %s1321_s17  ;;  %p1327_p2 = scmp.lt.s32.totalorder %s1321_s17, %s1321_s17 }
   0x8   :  { %p1328_p3 = por %p1327_p2, %p1326_p1 }
   0xa   :  { %p1329_p4 = pnand %p1328_p3, %p1322_p0 }
   0xc   :  { %1332 = shalt.err (!%p1329_p4)
}
   0xd   :  { %s1423_s18 = smov 16   ;;  %s1424_s19 = smov 1  }
   0xe   :  { %42 = dma.hbm_to_vmem [thread:$0]  %s1954_s1, 128, %s37_s14, [#allocation8], %s1423_s18, %s1423_s18, %s1424_s19  }
   0xf   :  { %s1341_s22 = scalar_lea.vmem %s25_s16, 128  ;;  %p1346_p6 = scmp.lt.s32.totalorder %s25_s16, %s25_s16 }
  0x10   :  { %p1342_p5 = scmp.ne.s32.totalorder %s25_s16, %s1341_s22  ;;  %p1347_p7 = scmp.lt.s32.totalorder %s1341_s22, %s1341_s22 }
  0x12   :  { %p1348_p8 = por %p1347_p7, %p1346_p6 }
  0x14   :  { %p1349_p9 = pnand %p1348_p8, %p1342_p5 }
  0x16   :  { %1352 = shalt.err (!%p1349_p9)
}
  0x17   :  { %30 = dma.hbm_to_vmem [thread:$0]  %s1953_s0, 128, %s25_s16, [#allocation5], %s1423_s18, %s1423_s18, %s1424_s19  }
  0x18   :  { %s1425_s25 = smov [#allocation9]   ;;  %s1426_s27 = smov [#allocation10]  }
  0x19   :  { %s55_s26 = sshll.u32 %s1425_s25, 4  ;;  %s68_s28 = sshll.u32 %s1426_s27, 4  ;;  %s56_s26 = int_to_ptr.vmem [resolvable:$true] %s55_s26  ;;  %s69_s28 = int_to_ptr.vmem [resolvable:$true] %s68_s28 }
  0x1a   :  { %s1361_s29 = scalar_lea.vmem %s56_s26, 128  ;;  %p1366_p11 = scmp.lt.s32.totalorder %s56_s26, %s56_s26 }
  0x1b   :  { %p1362_p10 = scmp.ne.s32.totalorder %s56_s26, %s1361_s29  ;;  %p1367_p12 = scmp.lt.s32.totalorder %s1361_s29, %s1361_s29 }
  0x1d   :  { %p1368_p13 = por %p1367_p12, %p1366_p11 }
  0x1f   :  { %p1369_p0 = pnand %p1368_p13, %p1362_p10 }
  0x21   :  { %1372 = shalt.err (!%p1369_p0)
}
  0x22   :  { %58 = dma.hbm_to_vmem [thread:$0]  %s1958_s5, 128, %s56_s26, [#allocation8]  }
  0x23   :  { %s1381_s11 = scalar_lea.vmem %s69_s28, 512  ;;  %p1386_p2 = scmp.lt.s32.totalorder %s69_s28, %s69_s28 }
  0x24   :  { %p1382_p1 = scmp.ne.s32.totalorder %s69_s28, %s1381_s11  ;;  %p1387_p3 = scmp.lt.s32.totalorder %s1381_s11, %s1381_s11 }
  0x26   :  { %p1388_p4 = por %p1387_p3, %p1386_p2 }
  0x28   :  { %p1389_p5 = pnand %p1388_p4, %p1382_p1 }
  0x2a   :  { %1392 = shalt.err (!%p1389_p5)
}
  0x2b   :  { %s1427_s0 = smov 128   ;;  %s1428_s12 = smov 8  }
  0x2c   :  { %74 = dma.hbm_to_vmem [thread:$0]  %s1961_s8, 512, %s69_s28, [#allocation11], %s1427_s0, %s1427_s0, %s1428_s12  }
  0x2d   :  { %1413 = dma.done.wait [#allocation5], 128  }
  0x2e   :  { %1414 = vsyncadd [#allocation5], 4294967168 }
  0x2f   :  { %1415 = dma.done.wait [#allocation8], 256  }
  0x30   :  { %1416 = vsyncadd [#allocation8], 4294967040 }
  0x31   :  { %1417 = dma.done.wait [#allocation11], 512  }
  0x32   :  { %1418 = vsyncadd [#allocation11], 4294966784  ;;  %v89_v0 = vlaneseq  ;;  %v1429_v1 = vmov 0.0   ;;  %v1430_v2 = vmov 0   ;;  %v1517_v7 = vld [vmem:[#allocation7] ss:$0 sm:$0xff] }
  0x33   :  { %546 = vmatprep.mubr.f32.mxu1 %v1429_v1  ;;  %1269 = vset.pattern.permute.xlu0 %v1430_v2  ;;  %v1519_v8 = vld [vmem:[#allocation7 + $0x1] ss:$0 sm:$0xff]  ;;  %v1521_v9 = vld [vmem:[#allocation7 + $0x2] ss:$0 sm:$0xff]  ;;  %v1529_v10 = vld [vmem:[#allocation7 + $0x3] ss:$0 sm:$0xff] }
  0x34   :  { %v1504_v3 = vshrl.u32 %v89_v0, 7  ;;  %1270 = vset.pattern.permute.xlu1 %v1430_v2  ;;  %1220 = vmatprep.subr.mxu0 %v1429_v1  ;;  %v1531_v11 = vld [vmem:[#allocation7 + $0x4] ss:$0 sm:$0xff]  ;;  %v1533_v12 = vld [vmem:[#allocation7 + $0x5] ss:$0 sm:$0xff]  ;;  %v613_v55 = vld [vmem:[%s1959_s6 + $0x18] sm:$0xff] }
  0x35   :  { %v1542_v16 = vld [vmem:[#allocation7 + $0x6] ss:$0 sm:$0xff]  ;;  %v1549_v19 = vld [vmem:[#allocation7 + $0x7] ss:$0 sm:$0xff]  ;;  %v1551_v20 = vld [vmem:[#allocation4] ss:$0 sm:$0xff]  ;;  %639 = vperm.xlu0 %1269, %v613_v55  }
  0x36   :  { %v1509_v4 = vadd.s32 24, %v1504_v3  ;;  %v1512_v5 = vadd.s32 16, %v1504_v3  ;;  %v1515_v6 = vadd.s32 8, %v1504_v3  ;;  %v1560_v23 = vld [vmem:[%s1956_s3] ss:$0 sm:$0xff]  ;;  %v1659_v59 = vld [vmem:[%s1959_s6 + $0x8] sm:$0xff] }
  0x37   :  { %v1562_v24 = vld [vmem:[#allocation4 + $0x1] ss:$0 sm:$0xff]  ;;  %v1574_v28 = vld [vmem:[#allocation4 + $0x2] ss:$0 sm:$0xff]  ;;  %v1586_v31 = vld [vmem:[#allocation4 + $0x3] ss:$0 sm:$0xff]  ;;  %629 = vperm.xlu1 %1270, %v1659_v59  }
  0x38   :  { %vm318_vm0 = vcmp.eq.s32.totalorder %v1509_v4, %v1517_v7  ;;  %vm336_vm1 = vcmp.eq.s32.totalorder %v1509_v4, %v1519_v8  ;;  %vm354_vm2 = vcmp.eq.s32.totalorder %v1509_v4, %v1521_v9  ;;  %vm317_vm3 = vcmp.eq.s32.totalorder %v1512_v5, %v1517_v7  ;;  %v1572_v27 = vld [vmem:[%s1956_s3 + $0x1] ss:$0 sm:$0xff]  ;;  %v1584_v30 = vld [vmem:[%s1956_s3 + $0x2] ss:$0 sm:$0xff]  ;;  %v1599_v36 = vld [vmem:[%s1956_s3 + $0x3] ss:$0 sm:$0xff] }
  0x39   :  { %v322_v13 = vsel %vm318_vm0, 1.0, %v1429_v1  ;;  %v340_v14 = vsel %vm336_vm1, 1.0, %v1429_v1  ;;  %v358_v15 = vsel %vm354_vm2, 1.0, %v1429_v1  ;;  %vm372_vm4 = vcmp.eq.s32.totalorder %v1509_v4, %v1529_v10  ;;  %v1601_v37 = vld [vmem:[#allocation4 + $0x4] ss:$0 sm:$0xff]  ;;  %v612_v63 = vld [vmem:[%s1959_s6 + $0x10] sm:$0xff] }
  0x3a   :  { %v344_v17 = vadd.f32 %v340_v14, %v322_v13  ;;  %v376_v18 = vsel %vm372_vm4, 1.0, %v1429_v1  ;;  %vm390_vm5 = vcmp.eq.s32.totalorder %v1509_v4, %v1531_v11  ;;  %vm408_vm6 = vcmp.eq.s32.totalorder %v1509_v4, %v1533_v12  ;;  %v1612_v40 = vld [vmem:[%s1956_s3 + $0x4] ss:$0 sm:$0xff]  ;;  %v1614_v41 = vld [vmem:[#allocation4 + $0x5] ss:$0 sm:$0xff]  ;;  %634 = vperm.xlu0 %1269, %v612_v63  }
  0x3b   :  { %v394_v21 = vsel %vm390_vm5, 1.0, %v1429_v1  ;;  %v412_v22 = vsel %vm408_vm6, 1.0, %v1429_v1  ;;  %vm426_vm7 = vcmp.eq.s32.totalorder %v1509_v4, %v1542_v16  ;;  %vm444_vm8 = vcmp.eq.s32.totalorder %v1509_v4, %v1549_v19  ;;  %v1624_v44 = vld [vmem:[%s1956_s3 + $0x5] ss:$0 sm:$0xff]  ;;  %v1626_v45 = vld [vmem:[#allocation4 + $0x6] ss:$0 sm:$0xff] }
  0x3c   :  { %v362_v25 = vadd.f32 %v358_v15, %v344_v17  ;;  %v430_v26 = vsel %vm426_vm7, 1.0, %v1429_v1  ;;  %vm108_vm9 = vcmp.eq.s32.totalorder %v1509_v4, %v1551_v20  ;;  %vm133_vm10 = vcmp.eq.s32.totalorder %v1509_v4, %v1562_v24  ;;  %v1635_v49 = vld [vmem:[%s1956_s3 + $0x6] ss:$0 sm:$0xff]  ;;  %v1637_v50 = vld [vmem:[#allocation4 + $0x7] ss:$0 sm:$0xff] }
  0x3d   :  { %v119_v29 = vsel %vm108_vm9, %v1560_v23, 0.0  ;;  %vm159_vm11 = vcmp.eq.s32.totalorder %v1509_v4, %v1574_v28  ;;  %v321_v32 = vsel %vm317_vm3, 1.0, %v1429_v1  ;;  %v145_v34 = vsel %vm133_vm10, %v1572_v27, 0.0  ;;  %v1651_v57 = vld [vmem:[%s1956_s3 + $0x7] ss:$0 sm:$0xff] }
  0x3e   :  { %v380_v33 = vadd.f32 %v376_v18, %v362_v25  ;;  %v171_v35 = vsel %vm159_vm11, %v1584_v30, 0.0  ;;  %vm185_vm12 = vcmp.eq.s32.totalorder %v1509_v4, %v1586_v31  ;;  %v448_v38 = vsel %vm444_vm8, 1.0, %v1429_v1  ;;  %v610_v14 = vld [vmem:[%s1959_s6] sm:$0xff] }
  0x3f   :  { %v149_v39 = vadd.f32 %v145_v34, %v119_v29  ;;  %vm211_vm13 = vcmp.eq.s32.totalorder %v1509_v4, %v1601_v37  ;;  %vm335_vm14 = vcmp.eq.s32.totalorder %v1512_v5, %v1519_v8  ;;  %v197_v43 = vsel %vm185_vm12, %v1599_v36, 0.0  ;;  %624 = vperm.xlu1 %1270, %v610_v14  }
  0x40   :  { %v398_v42 = vadd.f32 %v394_v21, %v380_v33  ;;  %vm237_vm15 = vcmp.eq.s32.totalorder %v1509_v4, %v1614_v41  ;;  %v339_v46 = vsel %vm335_vm14, 1.0, %v1429_v1  ;;  %v223_v48 = vsel %vm211_vm13, %v1612_v40, 0.0 }
  0x41   :  { %v175_v47 = vadd.f32 %v171_v35, %v149_v39  ;;  %vm263_vm0 = vcmp.eq.s32.totalorder %v1509_v4, %v1626_v45  ;;  %v343_v51 = vadd.f32 %v339_v46, %v321_v32  ;;  %v249_v53 = vsel %vm237_vm15, %v1624_v44, 0.0 }
  0x42   :  { %v416_v52 = vadd.f32 %v412_v22, %v398_v42  ;;  %v275_v54 = vsel %vm263_vm0, %v1635_v49, 0.0  ;;  %vm353_vm1 = vcmp.eq.s32.totalorder %v1512_v5, %v1521_v9  ;;  %vm289_vm2 = vcmp.eq.s32.totalorder %v1509_v4, %v1637_v50 }
  0x43   :  { %v201_v56 = vadd.f32 %v197_v43, %v175_v47  ;;  %v357_v58 = vsel %vm353_vm1, 1.0, %v1429_v1  ;;  %vm371_vm3 = vcmp.eq.s32.totalorder %v1512_v5, %v1529_v10  ;;  %vm389_vm4 = vcmp.eq.s32.totalorder %v1512_v5, %v1531_v11 }
  0x44   :  { %v434_v60 = vadd.f32 %v430_v26, %v416_v52  ;;  %v361_v61 = vadd.f32 %v357_v58, %v343_v51  ;;  %v375_v62 = vsel %vm371_vm3, 1.0, %v1429_v1  ;;  %v393_v13 = vsel %vm389_vm4, 1.0, %v1429_v1 }
  0x45   :  { %v227_v0 = vadd.f32 %v223_v48, %v201_v56  ;;  %vm407_vm5 = vcmp.eq.s32.totalorder %v1512_v5, %v1533_v12  ;;  %vm425_vm6 = vcmp.eq.s32.totalorder %v1512_v5, %v1542_v16  ;;  %v301_v17 = vsel %vm289_vm2, %v1651_v57, 0.0 }
  0x46   :  { %v452_v15 = vadd.f32 %v448_v38, %v434_v60  ;;  %v379_v18 = vadd.f32 %v375_v62, %v361_v61  ;;  %v411_v21 = vsel %vm407_vm5, 1.0, %v1429_v1  ;;  %v429_v25 = vsel %vm425_vm6, 1.0, %v1429_v1 }
  0x47   :  { %v253_v22 = vadd.f32 %v249_v53, %v227_v0  ;;  %vm107_vm7 = vcmp.eq.s32.totalorder %v1512_v5, %v1551_v20  ;;  %vm132_vm8 = vcmp.eq.s32.totalorder %v1512_v5, %v1562_v24  ;;  %vm443_vm9 = vcmp.eq.s32.totalorder %v1512_v5, %v1549_v19 }
  0x48   :  { %506 = vmatprep.subr.mxu1 %v452_v15  ;;  %v397_v26 = vadd.f32 %v393_v13, %v379_v18  ;;  %v118_v29 = vsel %vm107_vm7, %v1560_v23, 0.0  ;;  %v144_v32 = vsel %vm132_vm8, %v1572_v27, 0.0  ;;  %vm158_vm10 = vcmp.eq.s32.totalorder %v1512_v5, %v1574_v28 }
  0x49   :  { %v279_v33 = vadd.f32 %v275_v54, %v253_v22  ;;  %v148_v34 = vadd.f32 %v144_v32, %v118_v29  ;;  %vm184_vm11 = vcmp.eq.s32.totalorder %v1512_v5, %v1586_v31  ;;  %v170_v38 = vsel %vm158_vm10, %v1584_v30, 0.0 }
  0x4a   :  { %v415_v35 = vadd.f32 %v411_v21, %v397_v26  ;;  %v196_v39 = vsel %vm184_vm11, %v1599_v36, 0.0  ;;  %vm210_vm12 = vcmp.eq.s32.totalorder %v1512_v5, %v1601_v37  ;;  %v447_v43 = vsel %vm443_vm9, 1.0, %v1429_v1 }
  0x4b   :  { %v305_v42 = vadd.f32 %v301_v17, %v279_v33  ;;  %v174_v46 = vadd.f32 %v170_v38, %v148_v34  ;;  %vm236_vm13 = vcmp.eq.s32.totalorder %v1512_v5, %v1614_v41  ;;  %v1431_v47 = vmov 1  }
  0x4c   :  { %1271 = vset.pattern.permute.xlu0 %v1431_v47  ;;  %v433_v48 = vadd.f32 %v429_v25, %v415_v35  ;;  %v222_v51 = vsel %vm210_vm12, %v1612_v40, 0.0  ;;  %vm262_vm14 = vcmp.eq.s32.totalorder %v1512_v5, %v1626_v45  ;;  %1272 = vset.pattern.permute.xlu1 %v1431_v47  ;;  %v248_v53 = vsel %vm236_vm13, %v1624_v44, 0.0 }
  0x4d   :  { %667 = vperm.xlu0 %1271, %v613_v55   ;;  %507 = vmatpush1.msra.mxu1 %v305_v42  ;;  %v200_v52 = vadd.f32 %v196_v39, %v174_v46  ;;  %vm288_vm15 = vcmp.eq.s32.totalorder %v1512_v5, %v1637_v50  ;;  %vm316_vm0 = vcmp.eq.s32.totalorder %v1515_v6, %v1517_v7  ;;  %v274_v61 = vsel %vm262_vm14, %v1635_v49, 0.0 }
  0x4e   :  { %663 = vperm.xlu1 %1272, %v612_v63   ;;  %v451_v54 = vadd.f32 %v447_v43, %v433_v48  ;;  %v320_v56 = vsel %vm316_vm0, 1.0, %v1429_v1  ;;  %vm334_vm1 = vcmp.eq.s32.totalorder %v1515_v6, %v1519_v8  ;;  %vm352_vm2 = vcmp.eq.s32.totalorder %v1515_v6, %v1521_v9 }
  0x4f   :  { %v226_v55 = vadd.f32 %v222_v51, %v200_v52  ;;  %v338_v58 = vsel %vm334_vm1, 1.0, %v1429_v1  ;;  %v356_v60 = vsel %vm352_vm2, 1.0, %v1429_v1  ;;  %vm370_vm3 = vcmp.eq.s32.totalorder %v1515_v6, %v1529_v10 }
  0x50   :  { %508 = vmatprep.subr.mxu1 %v451_v54  ;;  %v342_v62 = vadd.f32 %v338_v58, %v320_v56  ;;  %vm388_vm4 = vcmp.eq.s32.totalorder %v1515_v6, %v1531_v11  ;;  %vm406_vm5 = vcmp.eq.s32.totalorder %v1515_v6, %v1533_v12  ;;  %v300_v0 = vsel %vm288_vm15, %v1651_v57, 0.0 }
  0x51   :  { %655 = vperm.xlu0 %1271, %v610_v14   ;;  %v252_v63 = vadd.f32 %v248_v53, %v226_v55  ;;  %v374_v13 = vsel %vm370_vm3, 1.0, %v1429_v1  ;;  %v392_v15 = vsel %vm388_vm4, 1.0, %v1429_v1  ;;  %v410_v18 = vsel %vm406_vm5, 1.0, %v1429_v1 }
  0x52   :  { %659 = vperm.xlu1 %1272, %v1659_v59   ;;  %v360_v17 = vadd.f32 %v356_v60, %v342_v62  ;;  %vm424_vm6 = vcmp.eq.s32.totalorder %v1515_v6, %v1542_v16  ;;  %vm106_vm7 = vcmp.eq.s32.totalorder %v1515_v6, %v1551_v20  ;;  %vm442_vm8 = vcmp.eq.s32.totalorder %v1515_v6, %v1549_v19 }
  0x53   :  { %v278_v14 = vadd.f32 %v274_v61, %v252_v63  ;;  %v117_v21 = vsel %vm106_vm7, %v1560_v23, 0.0  ;;  %vm131_vm9 = vcmp.eq.s32.totalorder %v1515_v6, %v1562_v24  ;;  %vm157_vm10 = vcmp.eq.s32.totalorder %v1515_v6, %v1574_v28 }
  0x54   :  { %v378_v22 = vadd.f32 %v374_v13, %v360_v17  ;;  %v143_v59 = vsel %vm131_vm9, %v1572_v27, 0.0  ;;  %vm183_vm11 = vcmp.eq.s32.totalorder %v1515_v6, %v1586_v31  ;;  %v428_v26 = vsel %vm424_vm6, 1.0, %v1429_v1 }
  0x55   :  { %1274 = vset.pattern.permute.xlu0 %v1430_v2  ;;  %v304_v25 = vadd.f32 %v300_v0, %v278_v14  ;;  %v147_v29 = vadd.f32 %v143_v59, %v117_v21  ;;  %v169_v32 = vsel %vm157_vm10, %v1584_v30, 0.0  ;;  %v195_v34 = vsel %vm183_vm11, %v1599_v36, 0.0 }
  0x56   :  { %1273 = vset.pattern.permute.xlu1 %v1430_v2  ;;  %v396_v33 = vadd.f32 %v392_v15, %v378_v22  ;;  %vm209_vm12 = vcmp.eq.s32.totalorder %v1515_v6, %v1601_v37  ;;  %vm235_vm13 = vcmp.eq.s32.totalorder %v1515_v6, %v1614_v41  ;;  %v446_v35 = vsel %vm442_vm8, 1.0, %v1429_v1  ;;  %v1855_v22 = vld [vmem:[%s1955_s2] ss:$0 sm:$0xff] }
  0x57   :  { %509 = vmatpush1.msra.mxu1 %v304_v25  ;;  %v173_v38 = vadd.f32 %v169_v32, %v147_v29  ;;  %v221_v39 = vsel %vm209_vm12, %v1612_v40, 0.0  ;;  %vm261_vm14 = vcmp.eq.s32.totalorder %v1515_v6, %v1626_v45  ;;  %v247_v42 = vsel %vm235_vm13, %v1624_v44, 0.0  ;;  %v615_v32 = vld [vmem:[%s1962_s9 + $0x8] sm:$0xff] }
  0x58   :  { %v414_v2 = vadd.f32 %v410_v18, %v396_v33  ;;  %vm315_vm15 = vcmp.eq.s32.totalorder %v1504_v3, %v1517_v7  ;;  %vm333_vm0 = vcmp.eq.s32.totalorder %v1504_v3, %v1519_v8  ;;  %vm287_vm1 = vcmp.eq.s32.totalorder %v1515_v6, %v1637_v50  ;;  %689 = vperm.xlu0 %1274, %v615_v32  }
  0x59   :  { %v199_v43 = vadd.f32 %v195_v34, %v173_v38  ;;  %v319_v46 = vsel %vm315_vm15, 1.0, %v1429_v1  ;;  %v337_v48 = vsel %vm333_vm0, 1.0, %v1429_v1  ;;  %vm351_vm2 = vcmp.eq.s32.totalorder %v1504_v3, %v1521_v9  ;;  %v616_v38 = vld [vmem:[%s1962_s9 + $0x10] sm:$0xff] }
  0x5a   :  { %v432_v51 = vadd.f32 %v428_v26, %v414_v2  ;;  %v341_v52 = vadd.f32 %v337_v48, %v319_v46  ;;  %vm369_vm3 = vcmp.eq.s32.totalorder %v1504_v3, %v1529_v10  ;;  %v355_v53 = vsel %vm351_vm2, 1.0, %v1429_v1  ;;  %v614_v26 = vld [vmem:[%s1962_s9] sm:$0xff] }
  0x5b   :  { %v225_v7 = vadd.f32 %v221_v39, %v199_v43  ;;  %v373_v8 = vsel %vm369_vm3, 1.0, %v1429_v1  ;;  %vm387_vm4 = vcmp.eq.s32.totalorder %v1504_v3, %v1531_v11  ;;  %v273_v56 = vsel %vm261_vm14, %v1635_v49, 0.0  ;;  %684 = vperm.xlu1 %1273, %v614_v26  }
  0x5c   :  { %v450_v54 = vadd.f32 %v446_v35, %v432_v51  ;;  %v359_v55 = vadd.f32 %v355_v53, %v341_v52  ;;  %vm405_vm5 = vcmp.eq.s32.totalorder %v1504_v3, %v1533_v12  ;;  %v299_v10 = vsel %vm287_vm1, %v1651_v57, 0.0  ;;  %694 = vperm.xlu0 %1274, %v616_v38  }
  0x5d   :  { %v251_v9 = vadd.f32 %v247_v42, %v225_v7  ;;  %v391_v58 = vsel %vm387_vm4, 1.0, %v1429_v1  ;;  %v409_v11 = vsel %vm405_vm5, 1.0, %v1429_v1  ;;  %vm423_vm6 = vcmp.eq.s32.totalorder %v1504_v3, %v1542_v16  ;;  %v617_v42 = vld [vmem:[%s1962_s9 + $0x18] sm:$0xff] }
  0x5e   :  { %510 = vmatprep.subr.mxu1 %v450_v54  ;;  %v377_v60 = vadd.f32 %v373_v8, %v359_v55  ;;  %vm441_vm7 = vcmp.eq.s32.totalorder %v1504_v3, %v1549_v19  ;;  %vm105_vm8 = vcmp.eq.s32.totalorder %v1504_v3, %v1551_v20  ;;  %vm130_vm9 = vcmp.eq.s32.totalorder %v1504_v3, %v1562_v24 }
  0x5f   :  { %v277_v12 = vadd.f32 %v273_v56, %v251_v9  ;;  %v116_v61 = vsel %vm105_vm8, %v1560_v23, 0.0  ;;  %vm156_vm10 = vcmp.eq.s32.totalorder %v1504_v3, %v1574_v28  ;;  %v142_v63 = vsel %vm130_vm9, %v1572_v27, 0.0  ;;  %1275 = vset.pattern.permute.xlu1 %v1431_v47 }
  0x60   :  { %v395_v62 = vadd.f32 %v391_v58, %v377_v60  ;;  %v168_v16 = vsel %vm156_vm10, %v1584_v30, 0.0  ;;  %vm182_vm11 = vcmp.eq.s32.totalorder %v1504_v3, %v1586_v31  ;;  %v427_v20 = vsel %vm423_vm6, 1.0, %v1429_v1  ;;  %808 = vperm.xlu1 %1275, %v614_v26   ;;  %699 = vperm.xlu0 %1274, %v617_v42  }
  0x61   :  { %v303_v0 = vadd.f32 %v299_v10, %v277_v12  ;;  %v146_v13 = vadd.f32 %v142_v63, %v116_v61  ;;  %vm208_vm12 = vcmp.eq.s32.totalorder %v1504_v3, %v1601_v37  ;;  %v194_v24 = vsel %vm182_vm11, %v1599_v36, 0.0 }
  0x62   :  { %v413_v23 = vadd.f32 %v409_v11, %v395_v62  ;;  %v445_v27 = vsel %vm441_vm7, 1.0, %v1429_v1  ;;  %vm234_vm13 = vcmp.eq.s32.totalorder %v1504_v3, %v1614_v41  ;;  %v220_v31 = vsel %vm208_vm12, %v1612_v40, 0.0  ;;  %v457_v40 = vld [vmem:[%s1957_s4] sm:$0xff] }
  0x63   :  { %511 = vmatpush1.msra.mxu1 %v303_v0  ;;  %v172_v28 = vadd.f32 %v168_v16, %v146_v13  ;;  %vm260_vm14 = vcmp.eq.s32.totalorder %v1504_v3, %v1626_v45  ;;  %v246_v36 = vsel %vm234_vm13, %v1624_v44, 0.0  ;;  %vm286_vm15 = vcmp.eq.s32.totalorder %v1504_v3, %v1637_v50  ;;  %v458_v44 = vld [vmem:[%s1957_s4 + $0x8] sm:$0xff]  ;;  %v459_v45 = vld [vmem:[%s1957_s4 + $0x10] sm:$0xff]  ;;  %v678_v50 = vld [vmem:[%s1960_s7] sm:$0xff] }
  0x64   :  { %v431_v30 = vadd.f32 %v427_v20, %v413_v23  ;;  %v272_v19 = vsel %vm260_vm14, %v1635_v49, 0.0  ;;  %v298_v41 = vsel %vm286_vm15, %v1651_v57, 0.0  ;;  %vm469_vm0 = vcmask 261120   ;;  %v460_v49 = vld [vmem:[%s1957_s4 + $0x18] sm:$0xff]  ;;  %812 = vperm.xlu1 %1275, %v615_v32   ;;  %1276 = vset.pattern.permute.xlu0 %v1431_v47 }
  0x65   :  { %v198_v15 = vadd.f32 %v194_v24, %v172_v28  ;;  %v948_v57 = vadd.s32 120, %v1504_v3  ;;  %v947_v59 = vadd.s32 112, %v1504_v3  ;;  %v946_v25 = vadd.s32 104, %v1504_v3  ;;  %v679_v28 = vld [vmem:[%s1960_s7 + $0x8] sm:$0xff] }
  0x66   :  { %v449_v37 = vadd.f32 %v445_v27, %v431_v30  ;;  %v945_v29 = vadd.s32 96, %v1504_v3  ;;  %v1432_v33 = vmov 1.0   ;;  %v944_v34 = vadd.s32 88, %v1504_v3  ;;  %v680_v30 = vld [vmem:[%s1960_s7 + $0x10] sm:$0xff] }
  0x67   :  { %v224_v17 = vadd.f32 %v220_v31, %v198_v15  ;;  %vm969_vm1 = vcmp.eq.s32.totalorder %v948_v57, %v1855_v22  ;;  %vm968_vm2 = vcmp.eq.s32.totalorder %v947_v59, %v1855_v22  ;;  %vm967_vm3 = vcmp.eq.s32.totalorder %v946_v25, %v1855_v22 }
  0x68   :  { %512 = vmatprep.subr.mxu1 %v449_v37  ;;  %1221 = vmatpush3.msk.msra.mxu0 %vm969_vm1, %v1432_v33  ;;  %vm966_vm4 = vcmp.eq.s32.totalorder %v945_v29, %v1855_v22  ;;  %v943_v35 = vadd.s32 80, %v1504_v3  ;;  %vm965_vm5 = vcmp.eq.s32.totalorder %v944_v34, %v1855_v22  ;;  %v942_v39 = vadd.s32 72, %v1504_v3  ;;  %v681_v37 = vld [vmem:[%s1960_s7 + $0x18] sm:$0xff]  ;;  %s1434_s7 = smov [#allocation12]  }
  0x69   :  { %v250_v18 = vadd.f32 %v246_v36, %v224_v17  ;;  %1222 = vmatprep.subr.mxu0 %v1429_v1  ;;  %vm1433_vm6 = vmmov 0   ;;  %v941_v2 = vadd.s32 64, %v1504_v3  ;;  %v940_v43 = vadd.s32 56, %v1504_v3  ;;  %816 = vperm.xlu1 %1275, %v616_v38   ;;  %v803_v36 = vld [vmem:[#allocation10] sm:$0xff]  ;;  %s1087_s0 = sshll.u32 %s1434_s7, 4  ;;  %s1088_s0 = int_to_ptr.vmem [resolvable:$true] %s1087_s0 }
  0x6a   :  { %1223 = vmatpush3.msk.msra.mxu0 %vm968_vm2, %v1432_v33  ;;  %1252 = vmatprep.mubr.msk.f32.mxu0 %vm1433_vm6, %v1429_v1  ;;  %vm964_vm7 = vcmp.eq.s32.totalorder %v943_v35, %v1855_v22  ;;  %vm963_vm8 = vcmp.eq.s32.totalorder %v942_v39, %v1855_v22  ;;  %v939_v46 = vadd.s32 48, %v1504_v3  ;;  %v938_v48 = vadd.s32 40, %v1504_v3  ;;  %s1393_s12 = scalar_lea.vmem %s1088_s0, 16  ;;  %s1397_s13 = scalar_lea.vmem %s1088_s0, 32 }
  0x6b   :  { %v276_v14 = vadd.f32 %v272_v19, %v250_v18  ;;  %1224 = vmatprep.subr.mxu0 %v1429_v1  ;;  %vm962_vm9 = vcmp.eq.s32.totalorder %v941_v2, %v1855_v22  ;;  %vm961_vm10 = vcmp.eq.s32.totalorder %v940_v43, %v1855_v22  ;;  %v937_v51 = vadd.s32 32, %v1504_v3  ;;  %v804_v18 = vld [vmem:[#allocation10 + $0x8] sm:$0xff]  ;;  %p1394_p6 = scmp.ne.s32.totalorder %s1088_s0, %s1393_s12  ;;  %p1398_p7 = scmp.lt.s32.totalorder %s1088_s0, %s1088_s0 }
  0x6c   :  { %1225 = vmatpush3.msk.msra.mxu0 %vm967_vm3, %v1432_v33  ;;  %vm960_vm11 = vcmp.eq.s32.totalorder %v939_v46, %v1855_v22  ;;  %vm959_vm12 = vcmp.eq.s32.totalorder %v938_v48, %v1855_v22  ;;  %vm957_vm14 = vcmp.eq.s32.totalorder %v1509_v4, %v1855_v22  ;;  %vm956_vm15 = vcmp.eq.s32.totalorder %v1512_v5, %v1855_v22  ;;  %v1002_v4 = vld [vmem:[#allocation9] sm:$0xff]  ;;  %p1399_p8 = scmp.lt.s32.totalorder %s1397_s13, %s1393_s12 }
  0x6d   :  { %v302_v21 = vadd.f32 %v298_v41, %v276_v14  ;;  %1226 = vmatprep.subr.mxu0 %v1429_v1  ;;  %820 = vperm.xlu1 %1275, %v617_v42   ;;  %vm958_vm13 = vcmp.eq.s32.totalorder %v937_v51, %v1855_v22  ;;  %vm955_vm1 = vcmp.eq.s32.totalorder %v1515_v6, %v1855_v22  ;;  %v805_v41 = vld [vmem:[#allocation10 + $0x10] sm:$0xff]  ;;  %v806_v14 = vld [vmem:[#allocation10 + $0x18] sm:$0xff] }
  0x6e   :  { %1227 = vmatpush3.msk.msra.mxu0 %vm966_vm4, %v1432_v33  ;;  %vm954_vm2 = vcmp.eq.s32.totalorder %v1504_v3, %v1855_v22  ;;  %p1400_p9 = por %p1399_p8, %p1398_p7 }
  0x6f   :  { %513 = vmatpush1.msra.mxu1 %v302_v21  ;;  %1228 = vmatprep.subr.mxu0 %v1429_v1 }
  0x70   :  { %1129 = vmatmul.mubr.msk.f32.vlgmr.msra.gmra.mxu1 %vm469_vm0, %v457_v40  ;;  %1229 = vmatpush3.msk.msra.mxu0 %vm965_vm5, %v1432_v33  ;;  %p1401_p10 = pnand %p1400_p9, %p1394_p6 }
  0x71   :  { %552 = vmatprep.mubr.f32.mxu1 %v1429_v1  ;;  %1230 = vmatprep.subr.mxu0 %v1429_v1 }
  0x72   :  { %1231 = vmatpush3.msk.msra.mxu0 %vm964_vm7, %v1432_v33 }
  0x73   :  { %1232 = vmatprep.subr.mxu0 %v1429_v1 }
  0x74   :  { %1130 = vmatmul.mubr.msk.f32.gmra.mxu1 %vm469_vm0, %v458_v44  ;;  %1233 = vmatpush3.msk.msra.mxu0 %vm963_vm8, %v1432_v33 }
  0x75   :  { %558 = vmatprep.mubr.f32.mxu1 %v1429_v1  ;;  %1234 = vmatprep.subr.mxu0 %v1429_v1 }
  0x76   :  { %1235 = vmatpush3.msk.msra.mxu0 %vm962_vm9, %v1432_v33 }
  0x77   :  { %1236 = vmatprep.subr.mxu0 %v1429_v1 }
  0x78   :  { %1131 = vmatmul.mubr.msk.f32.gmra.mxu1 %vm469_vm0, %v459_v45  ;;  %1237 = vmatpush3.msk.msra.mxu0 %vm961_vm10, %v1432_v33 }
  0x79   :  { %564 = vmatprep.mubr.f32.mxu1 %v1429_v1  ;;  %1238 = vmatprep.subr.mxu0 %v1429_v1 }
  0x7a   :  { %1239 = vmatpush3.msk.msra.mxu0 %vm960_vm11, %v1432_v33 }
  0x7b   :  { %1240 = vmatprep.subr.mxu0 %v1429_v1 }
  0x7c   :  { %1132 = vmatmul.mubr.msk.f32.gmra.mxu1 %vm469_vm0, %v460_v49  ;;  %1241 = vmatpush3.msk.msra.mxu0 %vm959_vm12, %v1432_v33 }
  0x7d   :  { %1200 = vmatprep.mubr.msk.f32.mxu1 %vm469_vm0, %v678_v50  ;;  %1242 = vmatprep.subr.mxu0 %v1429_v1 }
  0x7e   :  { %1243 = vmatpush3.msk.msra.mxu0 %vm958_vm13, %v1432_v33 }
  0x7f   :  { %1244 = vmatprep.subr.mxu0 %v1429_v1 }
  0x80   :  { %1245 = vmatpush3.msk.msra.mxu0 %vm957_vm14, %v1432_v33 }
  0x81   :  { %1246 = vmatprep.subr.mxu0 %v1429_v1 }
  0x82   :  { %1247 = vmatpush3.msk.msra.mxu0 %vm956_vm15, %v1432_v33 }
  0x83   :  { %1248 = vmatprep.subr.mxu0 %v1429_v1 }
  0x84   :  { %1249 = vmatpush3.msk.msra.mxu0 %vm955_vm1, %v1432_v33 }
  0x85   :  { %1250 = vmatprep.subr.mxu0 %v1429_v1 }
  0x86   :  { %1251 = vmatpush3.msk.msra.mxu0 %vm954_vm2, %v1432_v33 }
  0x87   :  { %1253 = vmatmul.mubr.f32.vlgmr.msra.gmra.mxu0 %v1002_v4 }
  0xb0   :  { %v640_v7 = vpop.permute.xlu0 %639 }
  0xb2   :  { %v630_v47 = vpop.permute.xlu1 %629 }
  0xb5   :  { %v635_v56 = vpop.permute.xlu0 %634 }
  0xba   :  { %v625_v8 = vpop.permute.xlu1 %624 }
  0xc8   :  { %v668_v1 = vpop.permute.xlu0 %667 }
  0xc9   :  { %v664_v58 = vpop.permute.xlu1 %663 }
  0xcc   :  { %v656_v16 = vpop.permute.xlu0 %655 }
  0xcd   :  { %v660_v62 = vpop.permute.xlu1 %659 }
  0xd3   :  { %v690_v49 = vpop.permute.xlu0 %689 }
  0xd6   :  { %v685_v44 = vpop.permute.xlu1 %684 }
  0xd7   :  { %v695_v25 = vpop.permute.xlu0 %694 }
  0xdb   :  { %v809_v45 = vpop.permute.xlu1 %808  ;;  %v700_v42 = vpop.permute.xlu0 %699 }
  0xdf   :  { %v813_v57 = vpop.permute.xlu1 %812 }
  0xe4   :  { %v817_v29 = vpop.permute.xlu1 %816 }
  0xe8   :  { %v821_v46 = vpop.permute.xlu1 %820 }
 0x130   :  { %v548_v5 = vpop.f32.mrf.mxu1 }
 0x131   :  { %v642_v12 = vadd.f32 %v625_v8, %v548_v5 }
 0x132   :  { %v550_v52 = vpop.f32.mrf.mxu1 }
 0x133   :  { %v670_v20 = vadd.f32 %v656_v16, %v550_v52 }
 0x134   :  { %v554_v6 = vpop.f32.mrf.mxu1 }
 0x135   :  { %v643_v11 = vadd.f32 %v630_v47, %v554_v6 }
 0x136   :  { %v556_v53 = vpop.f32.mrf.mxu1 }
 0x137   :  { %v671_v0 = vadd.f32 %v660_v62, %v556_v53 }
 0x138   :  { %v560_v54 = vpop.f32.mrf.mxu1 }
 0x139   :  { %v644_v3 = vadd.f32 %v635_v56, %v560_v54 }
 0x13a   :  { %v562_v55 = vpop.f32.mrf.mxu1 }
 0x13b   :  { %v672_v63 = vadd.f32 %v664_v58, %v562_v55 }
 0x13c   :  { %v566_v9 = vpop.f32.mrf.mxu1 }
 0x13d   :  { %v645_v10 = vadd.f32 %v640_v7, %v566_v9 }
 0x13e   :  { %v568_v60 = vpop.f32.mrf.mxu1 }
 0x13f   :  { %1277 = vtanh.f32 %v645_v10  ;;  %v673_v61 = vadd.f32 %v668_v1, %v568_v60 }
 0x140   :  { %1279 = vtanh.f32 %v644_v3 }
 0x141   :  { %1281 = vtanh.f32 %v643_v11 }
 0x142   :  { %1283 = vtanh.f32 %v642_v12 }
 0x143   :  { %1285 = vtanh.f32 %v673_v61 }
 0x144   :  { %1287 = vtanh.f32 %v672_v63 }
 0x145   :  { %1289 = vtanh.f32 %v671_v0 }
 0x146   :  { %1291 = vtanh.f32 %v670_v20 }
 0x147   :  { %v1069_v21 = vpop.f32.mrf.mxu0 }
 0x149   :  { %v1254_v40 = vpop.f32.mrf.mxu0 }
 0x14c   :  { %v1278_v13 = vpop.eup %1277 }
 0x14d   :  { %1192 = vmatprep.subr.mxu1 %v1278_v13  ;;  %v1280_v23 = vpop.eup %1279 }
 0x14e   :  { %1193 = vmatpush3.msra.mxu1 %v1278_v13  ;;  %v1282_v24 = vpop.eup %1281 }
 0x14f   :  { %1194 = vmatprep.subr.mxu1 %v1280_v23  ;;  %v1284_v27 = vpop.eup %1283 }
 0x150   :  { %1195 = vmatpush3.msra.mxu1 %v1280_v23  ;;  %v1286_v31 = vpop.eup %1285 }
 0x151   :  { %1196 = vmatprep.subr.mxu1 %v1282_v24  ;;  %v1288_v15 = vpop.eup %1287 }
 0x152   :  { %1197 = vmatpush3.msra.mxu1 %v1282_v24  ;;  %v1290_v17 = vpop.eup %1289 }
 0x153   :  { %1198 = vmatprep.subr.mxu1 %v1284_v27  ;;  %v1292_v19 = vpop.eup %1291 }
 0x154   :  { %1199 = vmatpush3.msra.mxu1 %v1284_v27 }
 0x155   :  { %1201 = vmatmul.mubr.msk.f32.vlgmr.msra.gmra.mxu1 %vm469_vm0, %v679_v28  ;;  %1206 = vmatprep.subr.mxu1 %v1286_v31 }
 0x156   :  { %1207 = vmatpush3.msra.mxu1 %v1286_v31  ;;  %1203 = vmatprep.mubr.msk.f32.mxu1 %vm469_vm0, %v680_v30 }
 0x157   :  { %1208 = vmatprep.subr.mxu1 %v1288_v15 }
 0x158   :  { %1209 = vmatpush3.msra.mxu1 %v1288_v15 }
 0x159   :  { %1204 = vmatmul.mubr.msk.f32.gmra.mxu1 %vm469_vm0, %v681_v37  ;;  %1210 = vmatprep.subr.mxu1 %v1290_v17 }
 0x15a   :  { %1211 = vmatpush3.msra.mxu1 %v1290_v17  ;;  %1214 = vmatprep.mubr.msk.f32.mxu1 %vm469_vm0, %v803_v36 }
 0x15b   :  { %1212 = vmatprep.subr.mxu1 %v1292_v19 }
 0x15c   :  { %1213 = vmatpush3.msra.mxu1 %v1292_v19 }
 0x15d   :  { %1215 = vmatmul.mubr.msk.f32.vlgmr.msra.gmra.mxu1 %vm469_vm0, %v804_v18 }
 0x15e   :  { %1217 = vmatprep.mubr.msk.f32.mxu1 %vm469_vm0, %v805_v41 }
 0x161   :  { %1218 = vmatmul.mubr.msk.f32.gmra.mxu1 %vm469_vm0, %v806_v14 }
 0x215   :  { %v1202_v50 = vpop.f32.mrf.mxu1 }
 0x216   :  { %v786_v35 = vadd.f32 %v1202_v50, %v690_v49 }
 0x217   :  { %v780_v22 = vpop.f32.mrf.mxu1 }
 0x218   :  { %v781_v32 = vadd.f32 %v780_v22, %v685_v44 }
 0x219   :  { %v1205_v59 = vpop.f32.mrf.mxu1 }
 0x21a   :  { %1293 = vtanh.f32 %v781_v32  ;;  %v796_v4 = vadd.f32 %v1205_v59, %v700_v42 }
 0x21b   :  { %v790_v26 = vpop.f32.mrf.mxu1 }
 0x21c   :  { %v791_v39 = vadd.f32 %v790_v26, %v695_v25 }
 0x21d   :  { %v1216_v33 = vpop.f32.mrf.mxu1 }
 0x21e   :  { %v907_v34 = vadd.f32 %v1216_v33, %v813_v57 }
 0x21f   :  { %v901_v38 = vpop.f32.mrf.mxu1 }
 0x220   :  { %v902_v2 = vadd.f32 %v901_v38, %v809_v45  ;;  %1295 = vtanh.f32 %v907_v34 }
 0x221   :  { %v1219_v43 = vpop.f32.mrf.mxu1 }
 0x222   :  { %1297 = vtanh.f32 %v902_v2  ;;  %v917_v48 = vadd.f32 %v1219_v43, %v821_v46 }
 0x223   :  { %1299 = vtanh.f32 %v786_v35  ;;  %v911_v51 = vpop.f32.mrf.mxu1 }
 0x224   :  { %1301 = vtanh.f32 %v791_v39  ;;  %v912_v5 = vadd.f32 %v911_v51, %v817_v29 }
 0x225   :  { %1303 = vtanh.f32 %v917_v48 }
 0x226   :  { %1305 = vtanh.f32 %v912_v5 }
 0x227   :  { %1307 = vtanh.f32 %v796_v4  ;;  %v1294_v47 = vpop.eup %1293 }
 0x22d   :  { %v1296_v52 = vpop.eup %1295 }
 0x22f   :  { %v1298_v7 = vpop.eup %1297 }
 0x230   :  { %v1300_v6 = vpop.eup %1299  ;;  %v924_v53 = vmul.f32 %v1298_v7, %v1294_v47 }
 0x231   :  { %v1302_v8 = vpop.eup %1301  ;;  %v925_v56 = vmul.f32 %v1300_v6, %v1296_v52 }
 0x232   :  { %v1304_v54 = vpop.eup %1303 }
 0x233   :  { %v1306_v55 = vpop.eup %1305  ;;  %v928_v3 = vadd.f32 %v925_v56, %v924_v53 }
 0x234   :  { %v926_v9 = vmul.f32 %v1306_v55, %v1302_v8  ;;  %v1308_v10 = vpop.eup %1307 }
 0x235   :  { %v927_v58 = vmul.f32 %v1308_v10, %v1304_v54 }
 0x236   :  { %v929_v11 = vadd.f32 %v928_v3, %v926_v9 }
 0x238   :  { %v930_v1 = vadd.f32 %v929_v11, %v927_v58 }
 0x23a   :  { %v931_v60 = vrot.slane %v930_v1, 4 }
 0x23c   :  { %v932_v12 = vadd.f32 %v931_v60, %v930_v1 }
 0x23e   :  { %v933_v61 = vrot.slane %v932_v12, 2 }
 0x240   :  { %v934_v62 = vadd.f32 %v933_v61, %v932_v12 }
 0x242   :  { %v935_v63 = vrot.slane %v934_v62, 1 }
 0x244   :  { %v936_v16 = vadd.f32 %v935_v63, %v934_v62 }
 0x246   :  { %v1073_v0 = vadd.f32 %v1069_v21, %v936_v16 }
 0x248   :  { %v1158_v20 = vmul.f32 -1.442695, %v1073_v0 }
 0x24a   :  { %1309 = vpow2.f32 %v1158_v20 }
 0x257   :  { %v1310_v13 = vpop.eup %1309 }
 0x258   :  { %v1077_v23 = vadd.f32 1.0, %v1310_v13 }
 0x25a   :  { %1311 = vrcp.f32 %v1077_v23 }
 0x267   :  { %v1312_v24 = vpop.eup %1311 }
 0x268   :  { %1080 = vst [vmem:[#allocation12] sm:$0x1] %v1312_v24 }
 0x269   :  { %1404 = shalt.err (!%p1401_p10)
}
 0x26a   :  { %1090 = dma.vmem_to_hbm [thread:$0]  %s1088_s0, 16, %s1963_s10, [#allocation6]  }
 0x26b   :  { %1419 = dma.done.wait [#allocation6], 16  }
 0x26c   :  { %1420 = vsyncadd [#allocation6], 4294967280 }
 0x26d   :  { %1094 = vsyncpa [#allocation5], 1 }
 0x26e   :  { %1095 = vsyncpa [#allocation8], 1 }
 0x26f   :  { %1096 = vsyncpa [#allocation11], 1 }
 0x270   :  { %1097 = vsyncpa [#allocation6], 1 }

</bundles_post_ra>
